<compile_context>
chip_gen: v5e
topology: v5e:2x2
jax: 0.10.0
libtpu: 0.0.40
codegen_flags: <defaults>
</compile_context>

<pallas_src>
import functools

import jax
import jax.numpy as jnp
from jax.experimental import pallas as pl
from jax.experimental.pallas import tpu as pltpu


# ----------------------------- Pallas kernel --------------------------------


def gprgnn_fused_kernel(x_ref, adjT_ref, w1_ref, b1_ref, w2_ref, b2_ref, o_ref,
                        *, gammas, num_classes):
    """MLP -> GPR propagation (Horner form, transposed) -> log_softmax.

    gammas:      tuple of Python floats, length K+1 (compile-time constants).
    num_classes: real class count C; lanes >= C in w2/b2/out are zero padding.
    """
    # ---- MLP:  (N,F)bf16 @ (F,H)bf16 -> ReLU -> (N,H)bf16 @ (H,Cp)bf16 ----
    h = jnp.dot(x_ref[...], w1_ref[...], preferred_element_type=jnp.float32)
    h = jnp.maximum(h + b1_ref[...], 0.0)                     # b1 is (1,H) f32
    z = jnp.dot(h.astype(jnp.bfloat16), w2_ref[...],
                preferred_element_type=jnp.float32)
    z = z + b2_ref[...]                                       # (N, Cp); pad lanes == 0

    # ---- GPR propagation in transposed layout so A_T is the stationary RHS:
    #   acc_T = gamma_K z_T;  for k = K-1..0:  acc_T = acc_T @ A_T + gamma_k z_T
    adjT = adjT_ref[...]                                       # (N,N) bf16, resident
    zT = z.T                                                   # (Cp, N) f32
    zT_b = zT.astype(jnp.bfloat16)                             # bf16 copy lives through the chain
    acc = jnp.float32(gammas[-1]) * zT                         # f32 init; zT (f32) dead after this
    for k in range(len(gammas) - 2, -1, -1):                   # static -> unrolled
        acc = jnp.dot(acc.astype(jnp.bfloat16), adjT,
                      preferred_element_type=jnp.float32)
        acc = acc + jnp.float32(gammas[k]) * zT_b              # f32 scalar * bf16 -> f32

    # ---- back to node-major (N, Cp) and log_softmax over real class lanes ----
    logits = acc.T                                             # (N, Cp) f32
    # Pad lanes are exactly 0 through the whole chain, so the plain lane max is
    # a valid (>= real max) stabilizer: no masked select needed here.
    m = jnp.max(logits, axis=1, keepdims=True)
    zc = logits - m
    lane = jax.lax.broadcasted_iota(jnp.int32, logits.shape, dimension=1)
    mask = lane < num_classes
    ssum = jnp.sum(jnp.where(mask, jnp.exp(zc), 0.0), axis=1, keepdims=True)
    o_ref[...] = zc - jnp.log(ssum)                            # lane-dense (N, Cp) store


# ------------------------------ JAX wrapper ----------------------------------


def build_norm_adj(edge_index, num_nodes):
    """Dense GCN-normalized adjacency with self-loops: D^-1/2 (A + I) D^-1/2."""
    src, dst = edge_index[0], edge_index[1]
    a = jnp.zeros((num_nodes, num_nodes), jnp.float32)
    a = a.at[dst, src].set(1.0)
    idx = jnp.arange(num_nodes)
    a = a.at[idx, idx].set(1.0)
    deg = jnp.sum(a, axis=1)
    d_inv_sqrt = jnp.where(deg > 0, 1.0 / jnp.sqrt(deg), 0.0)
    return d_inv_sqrt[:, None] * a * d_inv_sqrt[None, :]


def gprgnn_forward(x, adj_norm, params, gammas, num_classes):
    """Fused GPRGNN forward. Returns (N, num_classes) log-probabilities."""
    n = x.shape[0]
    hidden = params["w1"].shape[1]
    classes = params["w2"].shape[1]
    assert classes == num_classes

    # Pad the class (lane) axis to a lane-dense 128 so the final store is an
    # unmasked vst.  Pad columns of w2 / b2 are zero => pad logits stay exactly
    # 0 through propagation and are masked out of the in-kernel exp-sum.
    cp = max(128, ((classes + 127) // 128) * 128)
    w2p = jnp.zeros((hidden, cp), jnp.float32).at[:, :classes].set(params["w2"])
    b2p = jnp.zeros((1, cp), jnp.float32).at[:, :classes].set(params["b2"])

    # bf16 MXU operands (f32 accumulation inside the kernel); biases stay f32.
    x_b = x.astype(jnp.bfloat16)
    w1_b = params["w1"].astype(jnp.bfloat16)
    w2_b = w2p.astype(jnp.bfloat16)
    # A^T precomputed once so it sits on the weight (RHS) side of every matmul.
    adjT_b = adj_norm.T.astype(jnp.bfloat16)

    vmem = pl.BlockSpec(memory_space=pltpu.MemorySpace.VMEM)

    out_padded = pl.pallas_call(
        functools.partial(
            gprgnn_fused_kernel,
            gammas=tuple(float(g) for g in gammas),
            num_classes=num_classes,
        ),
        out_shape=jax.ShapeDtypeStruct((n, cp), jnp.float32),
        in_specs=[vmem, vmem, vmem, vmem, vmem, vmem],
        out_specs=vmem,
    )(x_b, adjT_b, w1_b, params["b1"], w2_b, b2p)

    # NOTE: downstream consumers that tolerate the padded (N, 128) layout
    # should take `out_padded` directly and skip this extra copy.
    return out_padded[:, :num_classes]


def gprgnn_reference(x, adj_norm, params, gammas):
    """Pure-JAX f32 reference of the same forward pass (for tolerance check)."""
    h = jnp.maximum(x @ params["w1"] + params["b1"], 0.0)
    z = h @ params["w2"] + params["b2"]
    acc = gammas[-1] * z
    for k in range(len(gammas) - 2, -1, -1):
        acc = adj_norm @ acc + gammas[k] * z
    return jax.nn.log_softmax(acc, axis=1)


# --------------------------------- main ---------------------------------------


if __name__ == "__main__":
    # Small, TPU-friendly shapes
    N = 128          # nodes
    FEATURES = 16
    HIDDEN = 32
    CLASSES = 8
    K = 10
    ALPHA = 0.1
    N_EDGES = 512

    key = jax.random.PRNGKey(0)
    k_x, k_e, k_w1, k_b1, k_w2, k_b2 = jax.random.split(key, 6)

    # Node features
    x = jax.random.normal(k_x, (N, FEATURES), dtype=jnp.float32)

    # Random undirected edge_index (2, E)
    src = jax.random.randint(k_e, (N_EDGES,), 0, N)
    dst = jax.random.randint(jax.random.fold_in(k_e, 1), (N_EDGES,), 0, N)
    edge_index = jnp.stack(
        [jnp.concatenate([src, dst]), jnp.concatenate([dst, src])], axis=0
    )
    adj_norm = build_norm_adj(edge_index, N)

    # Deterministic parameter init (weights stored as (in, out) = W^T of torch Linear)
    params = {
        "w1": jax.random.normal(k_w1, (FEATURES, HIDDEN), jnp.float32)
        * (1.0 / jnp.sqrt(FEATURES)),
        "b1": jax.random.normal(k_b1, (1, HIDDEN), jnp.float32) * 0.01,
        "w2": jax.random.normal(k_w2, (HIDDEN, CLASSES), jnp.float32)
        * (1.0 / jnp.sqrt(HIDDEN)),
        "b2": jax.random.normal(k_b2, (1, CLASSES), jnp.float32) * 0.01,
    }

    # GPR / PPR-initialized gammas: gamma_k = alpha*(1-alpha)^k, gamma_K = (1-alpha)^K
    gammas = [ALPHA * (1.0 - ALPHA) ** k for k in range(K)] + [(1.0 - ALPHA) ** K]

    out = gprgnn_forward(x, adj_norm, params, gammas, CLASSES)
    out = jax.block_until_ready(out)

    # Sanity: shape, finiteness, rows sum (in prob space) to 1
    row_sums = jnp.sum(jnp.exp(out), axis=1)
    assert out.shape == (N, CLASSES)
    assert bool(jnp.all(jnp.isfinite(out)))
    assert bool(jnp.allclose(row_sums, 1.0, atol=1e-4))

    # Tolerance check against f32 reference (bf16 MXU chain compounds rounding).
    ref = gprgnn_reference(x, adj_norm, params, gammas)
    max_diff = float(jnp.max(jnp.abs(out - ref)))
    assert max_diff < 0.2, f"max |out - ref| = {max_diff}"

    print("KERNEL_OK")
</pallas_src>

<mosaic_0001>
module attributes {stable_mosaic.version = 11 : i64} {
  func.func @gprgnn_fused_kernel(%arg0: memref<128x16xbf16, #tpu.memory_space<vmem>>, %arg1: memref<128x128xbf16, #tpu.memory_space<vmem>>, %arg2: memref<16x32xbf16, #tpu.memory_space<vmem>>, %arg3: memref<1x32xf32, #tpu.memory_space<vmem>>, %arg4: memref<32x128xbf16, #tpu.memory_space<vmem>>, %arg5: memref<1x128xf32, #tpu.memory_space<vmem>>, %arg6: memref<128x128xf32, #tpu.memory_space<vmem>>) attributes {dimension_semantics = [], scalar_prefetch = 0 : i64, scratch_operands = 0 : i64, tpu.core_type = #tpu.core_type<tc>} {
    %c0 = arith.constant 0 : index
    %c0_0 = arith.constant 0 : index
    %0 = vector.load %arg0[%c0, %c0_0] : memref<128x16xbf16, #tpu.memory_space<vmem>>, vector<128x16xbf16>
    %c0_1 = arith.constant 0 : index
    %c0_2 = arith.constant 0 : index
    %1 = vector.load %arg2[%c0_1, %c0_2] : memref<16x32xbf16, #tpu.memory_space<vmem>>, vector<16x32xbf16>
    %cst = arith.constant dense<0.000000e+00> : vector<128x32xf32>
    %2 = tpu.matmul %0, %1, %cst {dimension_numbers = #tpu.dot_dimension_numbers<[1], [0], [0], [1], [0, 0, 1, 1], [], []>} : vector<128x16xbf16>, vector<16x32xbf16>, vector<128x32xf32> -> vector<128x32xf32>
    %c0_3 = arith.constant 0 : index
    %c0_4 = arith.constant 0 : index
    %3 = vector.load %arg3[%c0_3, %c0_4] : memref<1x32xf32, #tpu.memory_space<vmem>>, vector<1x32xf32>
    %4 = vector.broadcast %3 : vector<1x32xf32> to vector<128x32xf32>
    %5 = arith.addf %2, %4 : vector<128x32xf32>
    %cst_5 = arith.constant 0.000000e+00 : f32
    %6 = vector.broadcast %cst_5 : f32 to vector<128x32xf32>
    %7 = arith.maximumf %5, %6 : vector<128x32xf32>
    %8 = arith.truncf %7 : vector<128x32xf32> to vector<128x32xbf16>
    %c0_6 = arith.constant 0 : index
    %c0_7 = arith.constant 0 : index
    %9 = vector.load %arg4[%c0_6, %c0_7] : memref<32x128xbf16, #tpu.memory_space<vmem>>, vector<32x128xbf16>
    %cst_8 = arith.constant dense<0.000000e+00> : vector<128x128xf32>
    %10 = tpu.matmul %8, %9, %cst_8 {dimension_numbers = #tpu.dot_dimension_numbers<[1], [0], [0], [1], [0, 0, 1, 1], [], []>} : vector<128x32xbf16>, vector<32x128xbf16>, vector<128x128xf32> -> vector<128x128xf32>
    %c0_9 = arith.constant 0 : index
    %c0_10 = arith.constant 0 : index
    %11 = vector.load %arg5[%c0_9, %c0_10] : memref<1x128xf32, #tpu.memory_space<vmem>>, vector<1x128xf32>
    %12 = vector.broadcast %11 : vector<1x128xf32> to vector<128x128xf32>
    %13 = arith.addf %10, %12 : vector<128x128xf32>
    %c0_11 = arith.constant 0 : index
    %c0_12 = arith.constant 0 : index
    %14 = vector.load %arg1[%c0_11, %c0_12] : memref<128x128xbf16, #tpu.memory_space<vmem>>, vector<128x128xbf16>
    %15 = tpu.transpose %13, [1, 0] : vector<128x128xf32> -> vector<128x128xf32>
    %16 = arith.truncf %15 : vector<128x128xf32> to vector<128x128xbf16>
    %cst_13 = arith.constant 0.34867844 : f32
    %17 = vector.broadcast %cst_13 : f32 to vector<128x128xf32>
    %18 = arith.mulf %17, %15 : vector<128x128xf32>
    %19 = arith.truncf %18 : vector<128x128xf32> to vector<128x128xbf16>
    %cst_14 = arith.constant dense<0.000000e+00> : vector<128x128xf32>
    %20 = tpu.matmul %19, %14, %cst_14 {dimension_numbers = #tpu.dot_dimension_numbers<[1], [0], [0], [1], [0, 0, 1, 1], [], []>} : vector<128x128xbf16>, vector<128x128xbf16>, vector<128x128xf32> -> vector<128x128xf32>
    %21 = arith.extf %16 : vector<128x128xbf16> to vector<128x128xf32>
    %cst_15 = arith.constant 0.0387420505 : f32
    %22 = vector.broadcast %cst_15 : f32 to vector<128x128xf32>
    %23 = arith.mulf %22, %21 : vector<128x128xf32>
    %24 = arith.addf %20, %23 : vector<128x128xf32>
    %25 = arith.truncf %24 : vector<128x128xf32> to vector<128x128xbf16>
    %cst_16 = arith.constant dense<0.000000e+00> : vector<128x128xf32>
    %26 = tpu.matmul %25, %14, %cst_16 {dimension_numbers = #tpu.dot_dimension_numbers<[1], [0], [0], [1], [0, 0, 1, 1], [], []>} : vector<128x128xbf16>, vector<128x128xbf16>, vector<128x128xf32> -> vector<128x128xf32>
    %27 = arith.extf %16 : vector<128x128xbf16> to vector<128x128xf32>
    %cst_17 = arith.constant 0.0430467203 : f32
    %28 = vector.broadcast %cst_17 : f32 to vector<128x128xf32>
    %29 = arith.mulf %28, %27 : vector<128x128xf32>
    %30 = arith.addf %26, %29 : vector<128x128xf32>
    %31 = arith.truncf %30 : vector<128x128xf32> to vector<128x128xbf16>
    %cst_18 = arith.constant dense<0.000000e+00> : vector<128x128xf32>
    %32 = tpu.matmul %31, %14, %cst_18 {dimension_numbers = #tpu.dot_dimension_numbers<[1], [0], [0], [1], [0, 0, 1, 1], [], []>} : vector<128x128xbf16>, vector<128x128xbf16>, vector<128x128xf32> -> vector<128x128xf32>
    %33 = arith.extf %16 : vector<128x128xbf16> to vector<128x128xf32>
    %cst_19 = arith.constant 0.0478296913 : f32
    %34 = vector.broadcast %cst_19 : f32 to vector<128x128xf32>
    %35 = arith.mulf %34, %33 : vector<128x128xf32>
    %36 = arith.addf %32, %35 : vector<128x128xf32>
    %37 = arith.truncf %36 : vector<128x128xf32> to vector<128x128xbf16>
    %cst_20 = arith.constant dense<0.000000e+00> : vector<128x128xf32>
    %38 = tpu.matmul %37, %14, %cst_20 {dimension_numbers = #tpu.dot_dimension_numbers<[1], [0], [0], [1], [0, 0, 1, 1], [], []>} : vector<128x128xbf16>, vector<128x128xbf16>, vector<128x128xf32> -> vector<128x128xf32>
    %39 = arith.extf %16 : vector<128x128xbf16> to vector<128x128xf32>
    %cst_21 = arith.constant 5.314410e-02 : f32
    %40 = vector.broadcast %cst_21 : f32 to vector<128x128xf32>
    %41 = arith.mulf %40, %39 : vector<128x128xf32>
    %42 = arith.addf %38, %41 : vector<128x128xf32>
    %43 = arith.truncf %42 : vector<128x128xf32> to vector<128x128xbf16>
    %cst_22 = arith.constant dense<0.000000e+00> : vector<128x128xf32>
    %44 = tpu.matmul %43, %14, %cst_22 {dimension_numbers = #tpu.dot_dimension_numbers<[1], [0], [0], [1], [0, 0, 1, 1], [], []>} : vector<128x128xbf16>, vector<128x128xbf16>, vector<128x128xf32> -> vector<128x128xf32>
    %45 = arith.extf %16 : vector<128x128xbf16> to vector<128x128xf32>
    %cst_23 = arith.constant 5.904900e-02 : f32
    %46 = vector.broadcast %cst_23 : f32 to vector<128x128xf32>
    %47 = arith.mulf %46, %45 : vector<128x128xf32>
    %48 = arith.addf %44, %47 : vector<128x128xf32>
    %49 = arith.truncf %48 : vector<128x128xf32> to vector<128x128xbf16>
    %cst_24 = arith.constant dense<0.000000e+00> : vector<128x128xf32>
    %50 = tpu.matmul %49, %14, %cst_24 {dimension_numbers = #tpu.dot_dimension_numbers<[1], [0], [0], [1], [0, 0, 1, 1], [], []>} : vector<128x128xbf16>, vector<128x128xbf16>, vector<128x128xf32> -> vector<128x128xf32>
    %51 = arith.extf %16 : vector<128x128xbf16> to vector<128x128xf32>
    %cst_25 = arith.constant 6.561000e-02 : f32
    %52 = vector.broadcast %cst_25 : f32 to vector<128x128xf32>
    %53 = arith.mulf %52, %51 : vector<128x128xf32>
    %54 = arith.addf %50, %53 : vector<128x128xf32>
    %55 = arith.truncf %54 : vector<128x128xf32> to vector<128x128xbf16>
    %cst_26 = arith.constant dense<0.000000e+00> : vector<128x128xf32>
    %56 = tpu.matmul %55, %14, %cst_26 {dimension_numbers = #tpu.dot_dimension_numbers<[1], [0], [0], [1], [0, 0, 1, 1], [], []>} : vector<128x128xbf16>, vector<128x128xbf16>, vector<128x128xf32> -> vector<128x128xf32>
    %57 = arith.extf %16 : vector<128x128xbf16> to vector<128x128xf32>
    %cst_27 = arith.constant 7.290000e-02 : f32
    %58 = vector.broadcast %cst_27 : f32 to vector<128x128xf32>
    %59 = arith.mulf %58, %57 : vector<128x128xf32>
    %60 = arith.addf %56, %59 : vector<128x128xf32>
    %61 = arith.truncf %60 : vector<128x128xf32> to vector<128x128xbf16>
    %cst_28 = arith.constant dense<0.000000e+00> : vector<128x128xf32>
    %62 = tpu.matmul %61, %14, %cst_28 {dimension_numbers = #tpu.dot_dimension_numbers<[1], [0], [0], [1], [0, 0, 1, 1], [], []>} : vector<128x128xbf16>, vector<128x128xbf16>, vector<128x128xf32> -> vector<128x128xf32>
    %63 = arith.extf %16 : vector<128x128xbf16> to vector<128x128xf32>
    %cst_29 = arith.constant 8.100000e-02 : f32
    %64 = vector.broadcast %cst_29 : f32 to vector<128x128xf32>
    %65 = arith.mulf %64, %63 : vector<128x128xf32>
    %66 = arith.addf %62, %65 : vector<128x128xf32>
    %67 = arith.truncf %66 : vector<128x128xf32> to vector<128x128xbf16>
    %cst_30 = arith.constant dense<0.000000e+00> : vector<128x128xf32>
    %68 = tpu.matmul %67, %14, %cst_30 {dimension_numbers = #tpu.dot_dimension_numbers<[1], [0], [0], [1], [0, 0, 1, 1], [], []>} : vector<128x128xbf16>, vector<128x128xbf16>, vector<128x128xf32> -> vector<128x128xf32>
    %69 = arith.extf %16 : vector<128x128xbf16> to vector<128x128xf32>
    %cst_31 = arith.constant 9.000000e-02 : f32
    %70 = vector.broadcast %cst_31 : f32 to vector<128x128xf32>
    %71 = arith.mulf %70, %69 : vector<128x128xf32>
    %72 = arith.addf %68, %71 : vector<128x128xf32>
    %73 = arith.truncf %72 : vector<128x128xf32> to vector<128x128xbf16>
    %cst_32 = arith.constant dense<0.000000e+00> : vector<128x128xf32>
    %74 = tpu.matmul %73, %14, %cst_32 {dimension_numbers = #tpu.dot_dimension_numbers<[1], [0], [0], [1], [0, 0, 1, 1], [], []>} : vector<128x128xbf16>, vector<128x128xbf16>, vector<128x128xf32> -> vector<128x128xf32>
    %75 = arith.extf %16 : vector<128x128xbf16> to vector<128x128xf32>
    %cst_33 = arith.constant 1.000000e-01 : f32
    %76 = vector.broadcast %cst_33 : f32 to vector<128x128xf32>
    %77 = arith.mulf %76, %75 : vector<128x128xf32>
    %78 = arith.addf %74, %77 : vector<128x128xf32>
    %79 = tpu.transpose %78, [1, 0] : vector<128x128xf32> -> vector<128x128xf32>
    %cst_34 = arith.constant dense<0xFF800000> : vector<128xf32>
    %80 = vector.multi_reduction <maximumf>, %79, %cst_34 [1] : vector<128x128xf32> to vector<128xf32>
    %81 = vector.shape_cast %80 : vector<128xf32> to vector<128x1xf32>
    %82 = vector.broadcast %81 : vector<128x1xf32> to vector<128x128xf32>
    %83 = arith.subf %79, %82 : vector<128x128xf32>
    %84 = tpu.iota {dimensions = array<i32: 1>} : vector<128x128xi32>
    %c8_i32 = arith.constant 8 : i32
    %85 = vector.broadcast %c8_i32 : i32 to vector<128x128xi32>
    %86 = arith.cmpi slt, %84, %85 : vector<128x128xi32>
    %87 = math.exp %83 : vector<128x128xf32>
    %cst_35 = arith.constant 0.000000e+00 : f32
    %88 = vector.broadcast %cst_35 : f32 to vector<128x128xf32>
    %89 = arith.select %86, %87, %88 : vector<128x128xi1>, vector<128x128xf32>
    %cst_36 = arith.constant dense<0.000000e+00> : vector<128xf32>
    %90 = vector.multi_reduction <add>, %89, %cst_36 [1] : vector<128x128xf32> to vector<128xf32>
    %91 = vector.shape_cast %90 : vector<128xf32> to vector<128x1xf32>
    %92 = math.log %91 : vector<128x1xf32>
    %93 = vector.broadcast %92 : vector<128x1xf32> to vector<128x128xf32>
    %94 = arith.subf %83, %93 : vector<128x128xf32>
    %c0_37 = arith.constant 0 : index
    %c0_38 = arith.constant 0 : index
    %95 = vector.load %arg6[%c0_37, %c0_38] : memref<128x128xf32, #tpu.memory_space<vmem>>, vector<128x128xf32>
    tpu.vector_store %arg6[%c0_37, %c0_38], %94 {strides = array<i32>} : memref<128x128xf32, #tpu.memory_space<vmem>>, vector<128x128xf32>,
    return
  }
}

</mosaic_0001>

<bundles_post_ra>
// kernel: tpu_custom_call.1
= control target key start
LH: loop header
LB: loop body
LE: loop exit
PB: predicated region body
PF: predicated region fallthrough
CT: control target
= control target key end

     0   :  { %11 = vsyncpa [#allocation3], 0  ;;  %s2301_s0 = inlined_call_operand.vmem [shape: bf16[128,16], index: 0, kind: input, shape index: {}]   ;;  %s2302_s1 = inlined_call_operand.vmem [shape: bf16[128,128], index: 1, kind: input, shape index: {}]   ;;  %s2303_s2 = inlined_call_operand.vmem [shape: bf16[16,32], index: 2, kind: input, shape index: {}]   ;;  %s2304_s3 = inlined_call_operand.vmem [shape: f32[1,32], index: 3, kind: input, shape index: {}]   ;;  %s2305_s4 = inlined_call_operand.hbm [shape: bf16[32,128], index: 4, kind: input, shape index: {}]   ;;  %s2306_s5 = inlined_call_operand.vmem [shape: f32[1,128], index: 5, kind: input, shape index: {}]   ;;  %s2307_s6 = inlined_call_operand.hbm [shape: f32[128,128], index: 6, kind: output, shape index: {}]  }
   0x1   :  { %12 = vsyncpa [#allocation4], 0  ;;  %s25_s23 = sshll.u32 %s2305_s4, 4  ;;  %s1656_s24 = smov [#allocation2]   ;;  %s26_s23 = int_to_ptr.hbm [resolvable:$true] %s25_s23 }
   0x2   :  { %s27_s25 = sshll.u32 %s1656_s24, 4  ;;  %s1657_s26 = smov 64   ;;  %s28_s25 = int_to_ptr.vmem [resolvable:$true] %s27_s25 }
   0x3   :  { %s1658_s27 = smov 4  }
   0x4   :  { %33 = dma.hbm_to_vmem [thread:$0]  %s26_s23, 256, %s28_s25, [#allocation3], %s1657_s26, %s1657_s26, %s1658_s27  }
   0x5   :  { %1652 = dma.done.wait [#allocation3], 256  }
   0x6   :  { %1653 = vsyncadd [#allocation3], 4294967040  ;;  %v1521_v0 = vld [vmem:[%s2303_s2] sm:$0xff]  ;;  %vm109_vm0 = vcmask 130048   ;;  %v1514_v2 = vld [vmem:[%s2301_s0 + $0x8] sm:$0xff]  ;;  %vm227_vm1 = vcmask 261120  }
   0x7   :  { %v1513_v1 = vld [vmem:[%s2301_s0] sm:$0xff]  ;;  %141 = vmatpush.bf16.msra.mxu0 %v1521_v0  ;;  %v1515_v3 = vld [vmem:[%s2301_s0 + $0x10] sm:$0xff]  ;;  %v1516_v4 = vld [vmem:[%s2301_s0 + $0x18] sm:$0xff]  ;;  %s1408_s14 = sshll.u32 %s2307_s6, 4  ;;  %s1660_s15 = smov 128   ;;  %s1409_s14 = int_to_ptr.hbm [resolvable:$true] %s1408_s14 }
   0x8   :  { %v1517_v5 = vld [vmem:[%s2301_s0 + $0x20] sm:$0xff]  ;;  %v1518_v6 = vld [vmem:[%s2301_s0 + $0x28] sm:$0xff]  ;;  %v1519_v7 = vld [vmem:[%s2301_s0 + $0x30] sm:$0xff]  ;;  %s1661_s16 = smov 8  }
   0x9   :  { %v1523_v8 = vld [vmem:[#allocation2 + $0x8] sm:$0xff]  ;;  %v1522_v9 = vld [vmem:[#allocation2] sm:$0xff]  ;;  %v1520_v10 = vld [vmem:[%s2301_s0 + $0x38] sm:$0xff] }
   0xa   :  { %1457 = vmatmul.msk.bf16.vlgmr.msra.gmra.mxu0 %vm109_vm0, %v1513_v1  ;;  %258 = vmatpush.bf16.msra.mxu1 %v1523_v8  ;;  %v1538_v12 = vld [vmem:[%s2304_s3] ss:$0 sm:$0xff] }
   0xe   :  { %259 = vmatpush.bf16.msra.mxu1 %v1522_v9 }
  0x1a   :  { %1458 = vmatmul.msk.bf16.gmra.mxu0 %vm109_vm0, %v1514_v2 }
  0x2a   :  { %1459 = vmatmul.msk.bf16.gmra.mxu0 %vm109_vm0, %v1515_v3 }
  0x3a   :  { %1460 = vmatmul.msk.bf16.gmra.mxu0 %vm109_vm0, %v1516_v4  ;;  %v1749_v4 = vld [vmem:[%s2306_s5] ss:$0 sm:$0xff] }
  0x4a   :  { %1461 = vmatmul.msk.bf16.gmra.mxu0 %vm109_vm0, %v1517_v5 }
  0x5a   :  { %1462 = vmatmul.msk.bf16.gmra.mxu0 %vm109_vm0, %v1518_v6 }
  0x6a   :  { %1463 = vmatmul.msk.bf16.gmra.mxu0 %vm109_vm0, %v1519_v7 }
  0x7a   :  { %1464 = vmatmul.msk.bf16.gmra.mxu0 %vm109_vm0, %v1520_v10 }
  0x87   :  { %v143_v11 = vpop.f32.mrf.mxu0 }
  0x88   :  { %v144_v13 = vadd.f32 %v1538_v12, %v143_v11 }
  0x8a   :  { %v183_v16 = vmax.f32 %v144_v13, 0.0 }
  0x8f   :  { %v145_v14 = vpop.f32.mrf.mxu0 }
  0x90   :  { %v146_v15 = vadd.f32 %v1538_v12, %v145_v14 }
  0x92   :  { %v184_v17 = vmax.f32 %v146_v15, 0.0 }
  0x94   :  { %v199_v18 = vpack.c.bf16 %v184_v17, %v183_v16 }
  0x96   :  { %1473 = vmatmul.msk.bf16.vlgmr.msra.gmra.mxu1 %vm227_vm1, %v199_v18 }
  0x97   :  { %v148_v19 = vpop.f32.mrf.mxu0 }
  0x98   :  { %v149_v20 = vadd.f32 %v1538_v12, %v148_v19 }
  0x9a   :  { %v185_v23 = vmax.f32 %v149_v20, 0.0 }
  0x9f   :  { %v150_v21 = vpop.f32.mrf.mxu0 }
  0xa0   :  { %v151_v22 = vadd.f32 %v1538_v12, %v150_v21 }
  0xa2   :  { %v186_v24 = vmax.f32 %v151_v22, 0.0 }
  0xa4   :  { %v200_v25 = vpack.c.bf16 %v186_v24, %v185_v23 }
  0xa6   :  { %1474 = vmatmul.msk.bf16.gmra.mxu1 %vm227_vm1, %v200_v25 }
  0xa7   :  { %v153_v26 = vpop.f32.mrf.mxu0 }
  0xa8   :  { %v154_v27 = vadd.f32 %v1538_v12, %v153_v26 }
  0xaa   :  { %v187_v30 = vmax.f32 %v154_v27, 0.0 }
  0xaf   :  { %v155_v28 = vpop.f32.mrf.mxu0 }
  0xb0   :  { %v156_v29 = vadd.f32 %v1538_v12, %v155_v28 }
  0xb2   :  { %v188_v31 = vmax.f32 %v156_v29, 0.0  ;;  %v1766_v29 = vld [vmem:[%s2302_s1 + $0x38] sm:$0xff] }
  0xb3   :  { %469 = vmatpush.bf16.msra.mxu2 %v1766_v29  ;;  %542 = vmatpush.bf16.msra.mxu3 %v1766_v29 }
  0xb4   :  { %v201_v32 = vpack.c.bf16 %v188_v31, %v187_v30  ;;  %v1772_v30 = vld [vmem:[%s2302_s1 + $0x30] sm:$0xff]  ;;  %615 = vmatpush.bf16.msrb.mxu0 %v1766_v29  ;;  %688 = vmatpush.bf16.msrb.mxu1 %v1766_v29 }
  0xb6   :  { %1475 = vmatmul.msk.bf16.gmra.mxu1 %vm227_vm1, %v201_v32 }
  0xb7   :  { %v158_v33 = vpop.f32.mrf.mxu0  ;;  %470 = vmatpush.bf16.msra.mxu2 %v1772_v30  ;;  %543 = vmatpush.bf16.msra.mxu3 %v1772_v30 }
  0xb8   :  { %v159_v34 = vadd.f32 %v1538_v12, %v158_v33  ;;  %v1782_v33 = vld [vmem:[%s2302_s1 + $0x28] sm:$0xff]  ;;  %616 = vmatpush.bf16.msrb.mxu0 %v1772_v30  ;;  %689 = vmatpush.bf16.msrb.mxu1 %v1772_v30 }
  0xba   :  { %v189_v37 = vmax.f32 %v159_v34, 0.0  ;;  %v1791_v34 = vld [vmem:[%s2302_s1 + $0x20] sm:$0xff] }
  0xbb   :  { %471 = vmatpush.bf16.msra.mxu2 %v1782_v33  ;;  %544 = vmatpush.bf16.msra.mxu3 %v1782_v33 }
  0xbc   :  { %617 = vmatpush.bf16.msrb.mxu0 %v1782_v33  ;;  %690 = vmatpush.bf16.msrb.mxu1 %v1782_v33 }
  0xbf   :  { %v160_v35 = vpop.f32.mrf.mxu0  ;;  %472 = vmatpush.bf16.msra.mxu2 %v1791_v34  ;;  %545 = vmatpush.bf16.msra.mxu3 %v1791_v34 }
  0xc0   :  { %v161_v36 = vadd.f32 %v1538_v12, %v160_v35  ;;  %618 = vmatpush.bf16.msrb.mxu0 %v1791_v34  ;;  %691 = vmatpush.bf16.msrb.mxu1 %v1791_v34 }
  0xc2   :  { %v190_v38 = vmax.f32 %v161_v36, 0.0 }
  0xc4   :  { %v202_v39 = vpack.c.bf16 %v190_v38, %v189_v37  ;;  %v1801_v37 = vld [vmem:[%s2302_s1 + $0x18] sm:$0xff] }
  0xc5   :  { %473 = vmatpush.bf16.msra.mxu2 %v1801_v37  ;;  %546 = vmatpush.bf16.msra.mxu3 %v1801_v37 }
  0xc6   :  { %1476 = vmatmul.msk.bf16.gmra.mxu1 %vm227_vm1, %v202_v39  ;;  %619 = vmatpush.bf16.msrb.mxu0 %v1801_v37 }
  0xc7   :  { %v163_v40 = vpop.f32.mrf.mxu0  ;;  %692 = vmatpush.bf16.msrb.mxu1 %v1801_v37 }
  0xc8   :  { %v164_v41 = vadd.f32 %v1538_v12, %v163_v40 }
  0xca   :  { %v191_v44 = vmax.f32 %v164_v41, 0.0 }
  0xcf   :  { %v165_v42 = vpop.f32.mrf.mxu0 }
  0xd0   :  { %v166_v43 = vadd.f32 %v1538_v12, %v165_v42  ;;  %v1815_v42 = vld [vmem:[%s2302_s1 + $0x10] sm:$0xff] }
  0xd1   :  { %474 = vmatpush.bf16.msra.mxu2 %v1815_v42  ;;  %547 = vmatpush.bf16.msra.mxu3 %v1815_v42 }
  0xd2   :  { %v192_v45 = vmax.f32 %v166_v43, 0.0  ;;  %v1822_v43 = vld [vmem:[%s2302_s1 + $0x8] sm:$0xff]  ;;  %620 = vmatpush.bf16.msrb.mxu0 %v1815_v42  ;;  %693 = vmatpush.bf16.msrb.mxu1 %v1815_v42 }
  0xd4   :  { %v203_v46 = vpack.c.bf16 %v192_v45, %v191_v44  ;;  %v1833_v44 = vld [vmem:[%s2302_s1] sm:$0xff]  ;;  %s1659_s1 = smov [#allocation5]  }
  0xd5   :  { %475 = vmatpush.bf16.msra.mxu2 %v1822_v43  ;;  %548 = vmatpush.bf16.msra.mxu3 %v1822_v43  ;;  %s1406_s11 = sshll.u32 %s1659_s1, 4  ;;  %s1407_s11 = int_to_ptr.vmem [resolvable:$true] %s1406_s11 }
  0xd6   :  { %1477 = vmatmul.msk.bf16.gmra.mxu1 %vm227_vm1, %v203_v46  ;;  %621 = vmatpush.bf16.msrb.mxu0 %v1822_v43 }
  0xd7   :  { %v168_v47 = vpop.f32.mrf.mxu0  ;;  %694 = vmatpush.bf16.msrb.mxu1 %v1822_v43 }
  0xd8   :  { %v169_v48 = vadd.f32 %v1538_v12, %v168_v47 }
  0xd9   :  { %476 = vmatpush.bf16.msra.mxu2 %v1833_v44  ;;  %549 = vmatpush.bf16.msra.mxu3 %v1833_v44 }
  0xda   :  { %v193_v51 = vmax.f32 %v169_v48, 0.0  ;;  %622 = vmatpush.bf16.msrb.mxu0 %v1833_v44 }
  0xdb   :  { %695 = vmatpush.bf16.msrb.mxu1 %v1833_v44 }
  0xdd   :  { %761 = vmatpush.bf16.msrb.mxu2 %v1766_v29  ;;  %834 = vmatpush.bf16.msrb.mxu3 %v1766_v29 }
  0xde   :  { %907 = vmatpush.bf16.msra.mxu0 %v1766_v29 }
  0xdf   :  { %v170_v49 = vpop.f32.mrf.mxu0  ;;  %980 = vmatpush.bf16.msra.mxu1 %v1766_v29 }
  0xe0   :  { %v171_v50 = vadd.f32 %v1538_v12, %v170_v49 }
  0xe1   :  { %762 = vmatpush.bf16.msrb.mxu2 %v1772_v30  ;;  %835 = vmatpush.bf16.msrb.mxu3 %v1772_v30 }
  0xe2   :  { %v194_v52 = vmax.f32 %v171_v50, 0.0  ;;  %908 = vmatpush.bf16.msra.mxu0 %v1772_v30 }
  0xe3   :  { %981 = vmatpush.bf16.msra.mxu1 %v1772_v30 }
  0xe4   :  { %v204_v53 = vpack.c.bf16 %v194_v52, %v193_v51 }
  0xe5   :  { %763 = vmatpush.bf16.msrb.mxu2 %v1782_v33  ;;  %836 = vmatpush.bf16.msrb.mxu3 %v1782_v33 }
  0xe6   :  { %1478 = vmatmul.msk.bf16.gmra.mxu1 %vm227_vm1, %v204_v53  ;;  %909 = vmatpush.bf16.msra.mxu0 %v1782_v33 }
  0xe7   :  { %v173_v54 = vpop.f32.mrf.mxu0  ;;  %982 = vmatpush.bf16.msra.mxu1 %v1782_v33 }
  0xe8   :  { %v174_v55 = vadd.f32 %v1538_v12, %v173_v54 }
  0xe9   :  { %764 = vmatpush.bf16.msrb.mxu2 %v1791_v34  ;;  %837 = vmatpush.bf16.msrb.mxu3 %v1791_v34 }
  0xea   :  { %v195_v58 = vmax.f32 %v174_v55, 0.0  ;;  %910 = vmatpush.bf16.msra.mxu0 %v1791_v34 }
  0xeb   :  { %983 = vmatpush.bf16.msra.mxu1 %v1791_v34 }
  0xed   :  { %765 = vmatpush.bf16.msrb.mxu2 %v1801_v37  ;;  %838 = vmatpush.bf16.msrb.mxu3 %v1801_v37 }
  0xee   :  { %911 = vmatpush.bf16.msra.mxu0 %v1801_v37 }
  0xef   :  { %v175_v56 = vpop.f32.mrf.mxu0  ;;  %984 = vmatpush.bf16.msra.mxu1 %v1801_v37 }
  0xf0   :  { %v176_v57 = vadd.f32 %v1538_v12, %v175_v56 }
  0xf1   :  { %766 = vmatpush.bf16.msrb.mxu2 %v1815_v42  ;;  %839 = vmatpush.bf16.msrb.mxu3 %v1815_v42 }
  0xf2   :  { %v196_v59 = vmax.f32 %v176_v57, 0.0  ;;  %912 = vmatpush.bf16.msra.mxu0 %v1815_v42 }
  0xf3   :  { %985 = vmatpush.bf16.msra.mxu1 %v1815_v42 }
  0xf4   :  { %v205_v60 = vpack.c.bf16 %v196_v59, %v195_v58 }
  0xf5   :  { %767 = vmatpush.bf16.msrb.mxu2 %v1822_v43  ;;  %840 = vmatpush.bf16.msrb.mxu3 %v1822_v43 }
  0xf6   :  { %1479 = vmatmul.msk.bf16.gmra.mxu1 %vm227_vm1, %v205_v60  ;;  %913 = vmatpush.bf16.msra.mxu0 %v1822_v43 }
  0xf7   :  { %v178_v61 = vpop.f32.mrf.mxu0  ;;  %986 = vmatpush.bf16.msra.mxu1 %v1822_v43 }
  0xf8   :  { %v179_v62 = vadd.f32 %v1538_v12, %v178_v61 }
  0xf9   :  { %768 = vmatpush.bf16.msrb.mxu2 %v1833_v44  ;;  %841 = vmatpush.bf16.msrb.mxu3 %v1833_v44 }
  0xfa   :  { %v197_v1 = vmax.f32 %v179_v62, 0.0  ;;  %914 = vmatpush.bf16.msra.mxu0 %v1833_v44 }
  0xfb   :  { %987 = vmatpush.bf16.msra.mxu1 %v1833_v44 }
  0xff   :  { %v180_v63 = vpop.f32.mrf.mxu0 }
 0x100   :  { %v181_v0 = vadd.f32 %v1538_v12, %v180_v63 }
 0x102   :  { %v198_v2 = vmax.f32 %v181_v0, 0.0 }
 0x104   :  { %v206_v3 = vpack.c.bf16 %v198_v2, %v197_v1 }
 0x106   :  { %1480 = vmatmul.msk.bf16.gmra.mxu1 %vm227_vm1, %v206_v3 }
 0x113   :  { %v261_v5 = vpop.f32.mrf.mxu1 }
 0x114   :  { %v262_v6 = vadd.f32 %v1749_v4, %v261_v5 }
 0x116   :  { %317 = vxpose.xlu0.b32.start [1/16] %v262_v6, 128 }
 0x11b   :  { %v263_v7 = vpop.f32.mrf.mxu1 }
 0x11c   :  { %v264_v8 = vadd.f32 %v1749_v4, %v263_v7 }
 0x11e   :  { %318 = vxpose.xlu0.b32.cont [2/16] %v264_v8, 128 }
 0x123   :  { %v266_v9 = vpop.f32.mrf.mxu1 }
 0x124   :  { %v267_v10 = vadd.f32 %v1749_v4, %v266_v9 }
 0x126   :  { %319 = vxpose.xlu0.b32.cont [3/16] %v267_v10, 128 }
 0x12b   :  { %v268_v11 = vpop.f32.mrf.mxu1 }
 0x12c   :  { %v269_v12 = vadd.f32 %v1749_v4, %v268_v11 }
 0x12e   :  { %320 = vxpose.xlu0.b32.cont [4/16] %v269_v12, 128 }
 0x133   :  { %v271_v13 = vpop.f32.mrf.mxu1 }
 0x134   :  { %v272_v14 = vadd.f32 %v1749_v4, %v271_v13 }
 0x136   :  { %321 = vxpose.xlu0.b32.cont [5/16] %v272_v14, 128 }
 0x13b   :  { %v273_v15 = vpop.f32.mrf.mxu1 }
 0x13c   :  { %v274_v16 = vadd.f32 %v1749_v4, %v273_v15 }
 0x13e   :  { %322 = vxpose.xlu0.b32.cont [6/16] %v274_v16, 128 }
 0x143   :  { %v276_v17 = vpop.f32.mrf.mxu1 }
 0x144   :  { %v277_v18 = vadd.f32 %v1749_v4, %v276_v17 }
 0x146   :  { %323 = vxpose.xlu0.b32.cont [7/16] %v277_v18, 128 }
 0x14b   :  { %v278_v19 = vpop.f32.mrf.mxu1 }
 0x14c   :  { %v279_v20 = vadd.f32 %v1749_v4, %v278_v19 }
 0x14e   :  { %324 = vxpose.xlu0.b32.cont [8/16] %v279_v20, 128 }
 0x153   :  { %v281_v21 = vpop.f32.mrf.mxu1 }
 0x154   :  { %v282_v22 = vadd.f32 %v1749_v4, %v281_v21 }
 0x156   :  { %325 = vxpose.xlu0.b32.cont [9/16] %v282_v22, 128 }
 0x15b   :  { %v283_v23 = vpop.f32.mrf.mxu1 }
 0x15c   :  { %v284_v24 = vadd.f32 %v1749_v4, %v283_v23 }
 0x15e   :  { %326 = vxpose.xlu0.b32.cont [10/16] %v284_v24, 128 }
 0x163   :  { %v286_v25 = vpop.f32.mrf.mxu1 }
 0x164   :  { %v287_v26 = vadd.f32 %v1749_v4, %v286_v25 }
 0x166   :  { %327 = vxpose.xlu0.b32.cont [11/16] %v287_v26, 128 }
 0x16b   :  { %v288_v27 = vpop.f32.mrf.mxu1 }
 0x16c   :  { %v289_v28 = vadd.f32 %v1749_v4, %v288_v27 }
 0x16e   :  { %328 = vxpose.xlu0.b32.cont [12/16] %v289_v28, 128 }
 0x173   :  { %v291_v31 = vpop.f32.mrf.mxu1 }
 0x174   :  { %v292_v32 = vadd.f32 %v1749_v4, %v291_v31 }
 0x176   :  { %329 = vxpose.xlu0.b32.cont [13/16] %v292_v32, 128 }
 0x17b   :  { %v293_v35 = vpop.f32.mrf.mxu1 }
 0x17c   :  { %v294_v36 = vadd.f32 %v1749_v4, %v293_v35 }
 0x17e   :  { %330 = vxpose.xlu0.b32.cont [14/16] %v294_v36, 128 }
 0x183   :  { %v296_v38 = vpop.f32.mrf.mxu1 }
 0x184   :  { %v297_v39 = vadd.f32 %v1749_v4, %v296_v38 }
 0x186   :  { %331 = vxpose.xlu0.b32.cont [15/16] %v297_v39, 128 }
 0x18b   :  { %v298_v40 = vpop.f32.mrf.mxu1 }
 0x18c   :  { %v299_v41 = vadd.f32 %v1749_v4, %v298_v40 }
 0x18e   :  { %332 = vxpose.xlu0.b32.end [16/16] %v299_v41, 128 }
 0x1ba   :  { %v1859_v45 = vpop.trf.xlu0 }
 0x1bb   :  { %v365_v47 = vmul.f32 0.34867844, %v1859_v45  ;;  %v349_v21 = vpack.c.bf16 %v1859_v45, %v1859_v45 }
 0x1bd   :  { %v1931_v24 = vunpack.c.l.bf16 %v349_v21 }
 0x1bf   :  { %v405_v26 = vmul.f32 0.03874205, %v1931_v24 }
 0x1c2   :  { %v1869_v46 = vpop.trf.xlu0 }
 0x1c3   :  { %v366_v48 = vmul.f32 0.34867844, %v1869_v46  ;;  %v350_v22 = vpack.c.bf16 %v1869_v46, %v1869_v46 }
 0x1c5   :  { %v381_v49 = vpack.c.bf16 %v366_v48, %v365_v47  ;;  %v1933_v25 = vunpack.c.l.bf16 %v350_v22 }
 0x1c7   :  { %477 = vmatmul.bf16.vlgmr.msra.gmra.mxu2 %v381_v49  ;;  %v406_v27 = vmul.f32 0.03874205, %v1933_v25 }
 0x1c8   :  { %1053 = vmatpush.bf16.msra.mxu2 %v1766_v29 }
 0x1ca   :  { %v1878_v50 = vpop.trf.xlu0 }
 0x1cb   :  { %v367_v52 = vmul.f32 0.34867844, %v1878_v50  ;;  %v351_v36 = vpack.c.bf16 %v1878_v50, %v1878_v50 }
 0x1cc   :  { %1054 = vmatpush.bf16.msra.mxu2 %v1772_v30 }
 0x1cd   :  { %v1943_v40 = vunpack.c.l.bf16 %v351_v36 }
 0x1cf   :  { %v407_v45 = vmul.f32 0.03874205, %v1943_v40 }
 0x1d0   :  { %1055 = vmatpush.bf16.msra.mxu2 %v1782_v33 }
 0x1d2   :  { %v1882_v51 = vpop.trf.xlu0 }
 0x1d3   :  { %v368_v53 = vmul.f32 0.34867844, %v1882_v51  ;;  %v352_v38 = vpack.c.bf16 %v1882_v51, %v1882_v51 }
 0x1d4   :  { %1056 = vmatpush.bf16.msra.mxu2 %v1791_v34 }
 0x1d5   :  { %v382_v54 = vpack.c.bf16 %v368_v53, %v367_v52  ;;  %v1945_v41 = vunpack.c.l.bf16 %v352_v38 }
 0x1d7   :  { %482 = vmatmul.bf16.gmra.mxu2 %v382_v54  ;;  %v408_v46 = vmul.f32 0.03874205, %v1945_v41 }
 0x1d8   :  { %1057 = vmatpush.bf16.msra.mxu2 %v1801_v37 }
 0x1da   :  { %v1888_v55 = vpop.trf.xlu0 }
 0x1db   :  { %v369_v57 = vmul.f32 0.34867844, %v1888_v55 }
 0x1dc   :  { %1058 = vmatpush.bf16.msra.mxu2 %v1815_v42 }
 0x1e0   :  { %1059 = vmatpush.bf16.msra.mxu2 %v1822_v43 }
 0x1e2   :  { %v1892_v56 = vpop.trf.xlu0 }
 0x1e3   :  { %v370_v58 = vmul.f32 0.34867844, %v1892_v56  ;;  %v354_v50 = vpack.c.bf16 %v1892_v56, %v1892_v56 }
 0x1e4   :  { %1060 = vmatpush.bf16.msra.mxu2 %v1833_v44 }
 0x1e5   :  { %v383_v59 = vpack.c.bf16 %v370_v58, %v369_v57  ;;  %v1959_v52 = vunpack.c.l.bf16 %v354_v50 }
 0x1e7   :  { %487 = vmatmul.bf16.gmra.mxu2 %v383_v59  ;;  %v410_v53 = vmul.f32 0.03874205, %v1959_v52 }
 0x1ea   :  { %v1897_v60 = vpop.trf.xlu0 }
 0x1eb   :  { %v371_v62 = vmul.f32 0.34867844, %v1897_v60 }
 0x1f2   :  { %v1899_v61 = vpop.trf.xlu0 }
 0x1f3   :  { %v372_v63 = vmul.f32 0.34867844, %v1899_v61  ;;  %v356_v56 = vpack.c.bf16 %v1899_v61, %v1899_v61 }
 0x1f5   :  { %v384_v0 = vpack.c.bf16 %v372_v63, %v371_v62 }
 0x1f7   :  { %492 = vmatmul.bf16.gmra.mxu2 %v384_v0 }
 0x1fa   :  { %v1903_v1 = vpop.trf.xlu0 }
 0x1fb   :  { %v373_v3 = vmul.f32 0.34867844, %v1903_v1 }
 0x202   :  { %v1905_v2 = vpop.trf.xlu0 }
 0x203   :  { %v374_v4 = vmul.f32 0.34867844, %v1905_v2  ;;  %v358_v61 = vpack.c.bf16 %v1905_v2, %v1905_v2 }
 0x205   :  { %v385_v5 = vpack.c.bf16 %v374_v4, %v373_v3 }
 0x207   :  { %497 = vmatmul.bf16.gmra.mxu2 %v385_v5 }
 0x20a   :  { %v1909_v6 = vpop.trf.xlu0 }
 0x20b   :  { %v375_v8 = vmul.f32 0.34867844, %v1909_v6 }
 0x212   :  { %v1911_v7 = vpop.trf.xlu0 }
 0x213   :  { %v376_v9 = vmul.f32 0.34867844, %v1911_v7  ;;  %v360_v2 = vpack.c.bf16 %v1911_v7, %v1911_v7 }
 0x215   :  { %v386_v10 = vpack.c.bf16 %v376_v9, %v375_v8  ;;  %v1981_v9 = vunpack.c.l.bf16 %v358_v61  ;;  %v1991_v22 = vunpack.c.l.bf16 %v360_v2 }
 0x217   :  { %502 = vmatmul.bf16.gmra.mxu2 %v386_v10 }
 0x21a   :  { %v1915_v11 = vpop.trf.xlu0 }
 0x21b   :  { %v377_v13 = vmul.f32 0.34867844, %v1915_v11 }
 0x222   :  { %v1917_v12 = vpop.trf.xlu0 }
 0x223   :  { %v378_v14 = vmul.f32 0.34867844, %v1917_v12  ;;  %v362_v7 = vpack.c.bf16 %v1917_v12, %v1917_v12 }
 0x225   :  { %v387_v15 = vpack.c.bf16 %v378_v14, %v377_v13  ;;  %v414_v13 = vmul.f32 0.03874205, %v1981_v9  ;;  %v2001_v38 = vunpack.c.l.bf16 %v362_v7 }
 0x227   :  { %507 = vmatmul.bf16.gmra.mxu2 %v387_v15 }
 0x22a   :  { %v1921_v16 = vpop.trf.xlu0 }
 0x22b   :  { %v379_v18 = vmul.f32 0.34867844, %v1921_v16 }
 0x232   :  { %v1923_v17 = vpop.trf.xlu0 }
 0x233   :  { %v380_v19 = vmul.f32 0.34867844, %v1923_v17  ;;  %v364_v12 = vpack.c.bf16 %v1923_v17, %v1923_v17 }
 0x235   :  { %v388_v20 = vpack.c.bf16 %v380_v19, %v379_v18  ;;  %v2011_v50 = vunpack.c.l.bf16 %v364_v12 }
 0x237   :  { %512 = vmatmul.bf16.gmra.mxu2 %v388_v20 }
 0x24a   :  { %v478_v23 = vpop.f32.mrf.mxu2 }
 0x24b   :  { %v479_v31 = vadd.f32 %v478_v23, %v405_v26  ;;  %v416_v26 = vmul.f32 0.03874205, %v1991_v22 }
 0x252   :  { %v480_v28 = vpop.f32.mrf.mxu2 }
 0x253   :  { %v481_v32 = vadd.f32 %v480_v28, %v406_v27 }
 0x255   :  { %v518_v35 = vpack.c.bf16 %v481_v32, %v479_v31 }
 0x257   :  { %550 = vmatmul.bf16.vlgmr.msra.gmra.mxu3 %v518_v35 }
 0x258   :  { %1126 = vmatpush.bf16.msra.mxu3 %v1766_v29 }
 0x25a   :  { %v483_v39 = vpop.f32.mrf.mxu2 }
 0x25b   :  { %v484_v47 = vadd.f32 %v483_v39, %v407_v45  ;;  %v418_v45 = vmul.f32 0.03874205, %v2001_v38 }
 0x25c   :  { %1127 = vmatpush.bf16.msra.mxu3 %v1772_v30  ;;  %v353_v30 = vpack.c.bf16 %v1888_v55, %v1888_v55 }
 0x25e   :  { %v1957_v51 = vunpack.c.l.bf16 %v353_v30 }
 0x260   :  { %1128 = vmatpush.bf16.msra.mxu3 %v1782_v33 }
 0x262   :  { %v485_v29 = vpop.f32.mrf.mxu2 }
 0x263   :  { %v486_v48 = vadd.f32 %v485_v29, %v408_v46 }
 0x264   :  { %1129 = vmatpush.bf16.msra.mxu3 %v1791_v34  ;;  %v409_v34 = vmul.f32 0.03874205, %v1957_v51 }
 0x265   :  { %v519_v49 = vpack.c.bf16 %v486_v48, %v484_v47 }
 0x267   :  { %555 = vmatmul.bf16.gmra.mxu3 %v519_v49 }
 0x268   :  { %1130 = vmatpush.bf16.msra.mxu3 %v1801_v37 }
 0x26a   :  { %v488_v33 = vpop.f32.mrf.mxu2 }
 0x26b   :  { %v489_v54 = vadd.f32 %v488_v33, %v409_v34  ;;  %v420_v34 = vmul.f32 0.03874205, %v2011_v50 }
 0x26c   :  { %1131 = vmatpush.bf16.msra.mxu3 %v1815_v42  ;;  %v355_v42 = vpack.c.bf16 %v1897_v60, %v1897_v60  ;;  %v357_v60 = vpack.c.bf16 %v1903_v1, %v1903_v1  ;;  %v359_v1 = vpack.c.bf16 %v1909_v6, %v1909_v6  ;;  %v361_v6 = vpack.c.bf16 %v1915_v11, %v1915_v11 }
 0x26d   :  { %v363_v11 = vpack.c.bf16 %v1921_v16, %v1921_v16  ;;  %v526_v16 = vmul.f32 0.04304672, %v1931_v24 }
 0x26e   :  { %v1969_v59 = vunpack.c.l.bf16 %v355_v42  ;;  %v1979_v8 = vunpack.c.l.bf16 %v357_v60  ;;  %v1989_v21 = vunpack.c.l.bf16 %v359_v1  ;;  %v1999_v36 = vunpack.c.l.bf16 %v361_v6 }
 0x26f   :  { %v2009_v30 = vunpack.c.l.bf16 %v363_v11  ;;  %v527_v42 = vmul.f32 0.04304672, %v1933_v25  ;;  %v535_v6 = vmul.f32 0.04304672, %v1981_v9 }
 0x270   :  { %1132 = vmatpush.bf16.msra.mxu3 %v1822_v43  ;;  %v1971_v43 = vunpack.c.l.bf16 %v356_v56  ;;  %v411_v62 = vmul.f32 0.03874205, %v1969_v59  ;;  %v413_v10 = vmul.f32 0.03874205, %v1979_v8  ;;  %v415_v23 = vmul.f32 0.03874205, %v1989_v21 }
 0x271   :  { %v417_v39 = vmul.f32 0.03874205, %v1999_v36  ;;  %v419_v33 = vmul.f32 0.03874205, %v2009_v30  ;;  %v532_v2 = vmul.f32 0.04304672, %v1969_v59 }
 0x272   :  { %v490_v37 = vpop.f32.mrf.mxu2  ;;  %v412_v63 = vmul.f32 0.03874205, %v1971_v43 }
 0x273   :  { %v491_v57 = vadd.f32 %v490_v37, %v410_v53 }
 0x274   :  { %1133 = vmatpush.bf16.msra.mxu3 %v1833_v44 }
 0x275   :  { %v520_v55 = vpack.c.bf16 %v491_v57, %v489_v54 }
 0x277   :  { %560 = vmatmul.bf16.gmra.mxu3 %v520_v55 }
 0x27a   :  { %v493_v58 = vpop.f32.mrf.mxu2 }
 0x27b   :  { %v494_v3 = vadd.f32 %v493_v58, %v411_v62 }
 0x282   :  { %v495_v0 = vpop.f32.mrf.mxu2 }
 0x283   :  { %v496_v44 = vadd.f32 %v495_v0, %v412_v63  ;;  %v528_v0 = vmul.f32 0.04304672, %v1943_v40 }
 0x285   :  { %v521_v4 = vpack.c.bf16 %v496_v44, %v494_v3  ;;  %v529_v3 = vmul.f32 0.04304672, %v1945_v41 }
 0x287   :  { %565 = vmatmul.bf16.gmra.mxu3 %v521_v4 }
 0x28a   :  { %v498_v5 = vpop.f32.mrf.mxu2 }
 0x28b   :  { %v499_v15 = vadd.f32 %v498_v5, %v413_v10  ;;  %v530_v10 = vmul.f32 0.04304672, %v1957_v51 }
 0x292   :  { %v500_v14 = vpop.f32.mrf.mxu2 }
 0x293   :  { %v501_v18 = vadd.f32 %v500_v14, %v414_v13  ;;  %v531_v13 = vmul.f32 0.04304672, %v1959_v52 }
 0x295   :  { %v522_v19 = vpack.c.bf16 %v501_v18, %v499_v15 }
 0x297   :  { %570 = vmatmul.bf16.gmra.mxu3 %v522_v19 }
 0x29a   :  { %v503_v20 = vpop.f32.mrf.mxu2 }
 0x29b   :  { %v504_v28 = vadd.f32 %v503_v20, %v415_v23  ;;  %v533_v20 = vmul.f32 0.04304672, %v1971_v43 }
 0x2a2   :  { %v505_v27 = vpop.f32.mrf.mxu2 }
 0x2a3   :  { %v506_v31 = vadd.f32 %v505_v27, %v416_v26 }
 0x2a5   :  { %v523_v32 = vpack.c.bf16 %v506_v31, %v504_v28 }
 0x2a7   :  { %575 = vmatmul.bf16.gmra.mxu3 %v523_v32  ;;  %v534_v32 = vmul.f32 0.04304672, %v1979_v8 }
 0x2aa   :  { %v508_v35 = vpop.f32.mrf.mxu2 }
 0x2ab   :  { %v509_v29 = vadd.f32 %v508_v35, %v417_v39 }
 0x2b2   :  { %v510_v46 = vpop.f32.mrf.mxu2 }
 0x2b3   :  { %v511_v47 = vadd.f32 %v510_v46, %v418_v45 }
 0x2b5   :  { %v524_v48 = vpack.c.bf16 %v511_v47, %v509_v29  ;;  %v536_v29 = vmul.f32 0.04304672, %v1989_v21  ;;  %v537_v47 = vmul.f32 0.04304672, %v1991_v22 }
 0x2b7   :  { %580 = vmatmul.bf16.gmra.mxu3 %v524_v48 }
 0x2ba   :  { %v513_v49 = vpop.f32.mrf.mxu2 }
 0x2bb   :  { %v514_v37 = vadd.f32 %v513_v49, %v419_v33 }
 0x2c2   :  { %v515_v53 = vpop.f32.mrf.mxu2 }
 0x2c3   :  { %v516_v54 = vadd.f32 %v515_v53, %v420_v34  ;;  %v538_v34 = vmul.f32 0.04304672, %v1999_v36  ;;  %v539_v53 = vmul.f32 0.04304672, %v2001_v38 }
 0x2c5   :  { %v525_v57 = vpack.c.bf16 %v516_v54, %v514_v37 }
 0x2c7   :  { %585 = vmatmul.bf16.gmra.mxu3 %v525_v57 }
 0x2da   :  { %v551_v55 = vpop.f32.mrf.mxu3 }
 0x2db   :  { %v552_v56 = vadd.f32 %v551_v55, %v526_v16 }
 0x2e2   :  { %v553_v17 = vpop.f32.mrf.mxu3 }
 0x2e3   :  { %v554_v58 = vadd.f32 %v553_v17, %v527_v42  ;;  %v540_v42 = vmul.f32 0.04304672, %v2009_v30  ;;  %v541_v17 = vmul.f32 0.04304672, %v2011_v50 }
 0x2e5   :  { %v591_v62 = vpack.c.bf16 %v554_v58, %v552_v56 }
 0x2e7   :  { %623 = vmatmul.bf16.vlgmr.msrb.gmra.mxu0 %v591_v62 }
 0x2ea   :  { %v556_v63 = vpop.f32.mrf.mxu3 }
 0x2eb   :  { %v557_v4 = vadd.f32 %v556_v63, %v528_v0 }
 0x2f2   :  { %v558_v44 = vpop.f32.mrf.mxu3 }
 0x2f3   :  { %v559_v60 = vadd.f32 %v558_v44, %v529_v3  ;;  %v599_v3 = vmul.f32 0.04782969, %v1931_v24  ;;  %v600_v44 = vmul.f32 0.04782969, %v1933_v25 }
 0x2f5   :  { %v592_v61 = vpack.c.bf16 %v559_v60, %v557_v4 }
 0x2f7   :  { %628 = vmatmul.bf16.gmra.mxu0 %v592_v61 }
 0x2fa   :  { %v561_v5 = vpop.f32.mrf.mxu3 }
 0x2fb   :  { %v562_v15 = vadd.f32 %v561_v5, %v530_v10 }
 0x302   :  { %v563_v14 = vpop.f32.mrf.mxu3 }
 0x303   :  { %v564_v18 = vadd.f32 %v563_v14, %v531_v13  ;;  %v601_v13 = vmul.f32 0.04782969, %v1943_v40  ;;  %v602_v14 = vmul.f32 0.04782969, %v1945_v41 }
 0x305   :  { %v593_v19 = vpack.c.bf16 %v564_v18, %v562_v15 }
 0x307   :  { %633 = vmatmul.bf16.gmra.mxu0 %v593_v19 }
 0x30a   :  { %v566_v1 = vpop.f32.mrf.mxu3 }
 0x30b   :  { %v567_v26 = vadd.f32 %v566_v1, %v532_v2 }
 0x312   :  { %v568_v23 = vpop.f32.mrf.mxu3 }
 0x313   :  { %v569_v27 = vadd.f32 %v568_v23, %v533_v20  ;;  %v603_v20 = vmul.f32 0.04782969, %v1957_v51  ;;  %v604_v23 = vmul.f32 0.04782969, %v1959_v52 }
 0x315   :  { %v594_v28 = vpack.c.bf16 %v569_v27, %v567_v26 }
 0x317   :  { %638 = vmatmul.bf16.gmra.mxu0 %v594_v28 }
 0x31a   :  { %v571_v31 = vpop.f32.mrf.mxu3 }
 0x31b   :  { %v572_v35 = vadd.f32 %v571_v31, %v534_v32 }
 0x322   :  { %v573_v7 = vpop.f32.mrf.mxu3 }
 0x323   :  { %v574_v39 = vadd.f32 %v573_v7, %v535_v6  ;;  %v605_v6 = vmul.f32 0.04782969, %v1969_v59  ;;  %v606_v7 = vmul.f32 0.04782969, %v1971_v43 }
 0x325   :  { %v595_v45 = vpack.c.bf16 %v574_v39, %v572_v35 }
 0x327   :  { %643 = vmatmul.bf16.gmra.mxu0 %v595_v45 }
 0x32a   :  { %v576_v46 = vpop.f32.mrf.mxu3 }
 0x32b   :  { %v577_v11 = vadd.f32 %v576_v46, %v536_v29 }
 0x332   :  { %v578_v48 = vpop.f32.mrf.mxu3 }
 0x333   :  { %v579_v12 = vadd.f32 %v578_v48, %v537_v47  ;;  %v607_v47 = vmul.f32 0.04782969, %v1979_v8  ;;  %v608_v48 = vmul.f32 0.04782969, %v1981_v9 }
 0x335   :  { %v596_v49 = vpack.c.bf16 %v579_v12, %v577_v11 }
 0x337   :  { %648 = vmatmul.bf16.gmra.mxu0 %v596_v49 }
 0x33a   :  { %v581_v33 = vpop.f32.mrf.mxu3 }
 0x33b   :  { %v582_v54 = vadd.f32 %v581_v33, %v538_v34 }
 0x342   :  { %v583_v37 = vpop.f32.mrf.mxu3 }
 0x343   :  { %v584_v57 = vadd.f32 %v583_v37, %v539_v53  ;;  %v609_v53 = vmul.f32 0.04782969, %v1989_v21  ;;  %v610_v37 = vmul.f32 0.04782969, %v1991_v22 }
 0x345   :  { %v597_v55 = vpack.c.bf16 %v584_v57, %v582_v54 }
 0x347   :  { %653 = vmatmul.bf16.gmra.mxu0 %v597_v55 }
 0x34a   :  { %v586_v16 = vpop.f32.mrf.mxu3 }
 0x34b   :  { %v587_v58 = vadd.f32 %v586_v16, %v540_v42 }
 0x352   :  { %v588_v56 = vpop.f32.mrf.mxu3 }
 0x353   :  { %v589_v62 = vadd.f32 %v588_v56, %v541_v17  ;;  %v611_v17 = vmul.f32 0.04782969, %v1999_v36  ;;  %v612_v56 = vmul.f32 0.04782969, %v2001_v38 }
 0x355   :  { %v598_v63 = vpack.c.bf16 %v589_v62, %v587_v58 }
 0x357   :  { %658 = vmatmul.bf16.gmra.mxu0 %v598_v63 }
 0x364   :  { %v624_v0 = vpop.f32.mrf.mxu0 }
 0x365   :  { %v625_v60 = vadd.f32 %v624_v0, %v599_v3 }
 0x36c   :  { %v626_v4 = vpop.f32.mrf.mxu0 }
 0x36d   :  { %v627_v61 = vadd.f32 %v626_v4, %v600_v44  ;;  %v613_v44 = vmul.f32 0.04782969, %v2009_v30  ;;  %v614_v4 = vmul.f32 0.04782969, %v2011_v50 }
 0x36f   :  { %v664_v5 = vpack.c.bf16 %v627_v61, %v625_v60 }
 0x371   :  { %696 = vmatmul.bf16.vlgmr.msrb.gmra.mxu1 %v664_v5 }
 0x374   :  { %v629_v10 = vpop.f32.mrf.mxu0 }
 0x375   :  { %v630_v18 = vadd.f32 %v629_v10, %v601_v13 }
 0x37c   :  { %v631_v15 = vpop.f32.mrf.mxu0 }
 0x37d   :  { %v632_v19 = vadd.f32 %v631_v15, %v602_v14  ;;  %v672_v14 = vmul.f32 0.0531441, %v1931_v24  ;;  %v673_v15 = vmul.f32 0.0531441, %v1933_v25 }
 0x37f   :  { %v665_v1 = vpack.c.bf16 %v632_v19, %v630_v18 }
 0x381   :  { %701 = vmatmul.bf16.gmra.mxu1 %v665_v1 }
 0x384   :  { %v634_v2 = vpop.f32.mrf.mxu0 }
 0x385   :  { %v635_v27 = vadd.f32 %v634_v2, %v603_v20 }
 0x38c   :  { %v636_v26 = vpop.f32.mrf.mxu0 }
 0x38d   :  { %v637_v28 = vadd.f32 %v636_v26, %v604_v23  ;;  %v674_v23 = vmul.f32 0.0531441, %v1943_v40  ;;  %v675_v26 = vmul.f32 0.0531441, %v1945_v41 }
 0x38f   :  { %v666_v31 = vpack.c.bf16 %v637_v28, %v635_v27 }
 0x391   :  { %706 = vmatmul.bf16.gmra.mxu1 %v666_v31 }
 0x394   :  { %v639_v32 = vpop.f32.mrf.mxu0 }
 0x395   :  { %v640_v39 = vadd.f32 %v639_v32, %v605_v6 }
 0x39c   :  { %v641_v35 = vpop.f32.mrf.mxu0 }
 0x39d   :  { %v642_v45 = vadd.f32 %v641_v35, %v606_v7  ;;  %v676_v7 = vmul.f32 0.0531441, %v1957_v51  ;;  %v677_v35 = vmul.f32 0.0531441, %v1959_v52 }
 0x39f   :  { %v667_v46 = vpack.c.bf16 %v642_v45, %v640_v39 }
 0x3a1   :  { %711 = vmatmul.bf16.gmra.mxu1 %v667_v46 }
 0x3a4   :  { %v644_v29 = vpop.f32.mrf.mxu0 }
 0x3a5   :  { %v645_v12 = vadd.f32 %v644_v29, %v607_v47 }
 0x3ac   :  { %v646_v11 = vpop.f32.mrf.mxu0 }
 0x3ad   :  { %v647_v49 = vadd.f32 %v646_v11, %v608_v48  ;;  %v678_v48 = vmul.f32 0.0531441, %v1969_v59  ;;  %v679_v11 = vmul.f32 0.0531441, %v1971_v43 }
 0x3af   :  { %v668_v33 = vpack.c.bf16 %v647_v49, %v645_v12 }
 0x3b1   :  { %716 = vmatmul.bf16.gmra.mxu1 %v668_v33 }
 0x3b4   :  { %v649_v34 = vpop.f32.mrf.mxu0 }
 0x3b5   :  { %v650_v57 = vadd.f32 %v649_v34, %v609_v53 }
 0x3bc   :  { %v651_v54 = vpop.f32.mrf.mxu0 }
 0x3bd   :  { %v652_v55 = vadd.f32 %v651_v54, %v610_v37  ;;  %v680_v37 = vmul.f32 0.0531441, %v1979_v8  ;;  %v681_v54 = vmul.f32 0.0531441, %v1981_v9 }
 0x3bf   :  { %v669_v16 = vpack.c.bf16 %v652_v55, %v650_v57 }
 0x3c1   :  { %721 = vmatmul.bf16.gmra.mxu1 %v669_v16 }
 0x3c4   :  { %v654_v42 = vpop.f32.mrf.mxu0 }
 0x3c5   :  { %v655_v62 = vadd.f32 %v654_v42, %v611_v17 }
 0x3cc   :  { %v656_v58 = vpop.f32.mrf.mxu0 }
 0x3cd   :  { %v657_v63 = vadd.f32 %v656_v58, %v612_v56  ;;  %v682_v56 = vmul.f32 0.0531441, %v1989_v21  ;;  %v683_v58 = vmul.f32 0.0531441, %v1991_v22 }
 0x3cf   :  { %v670_v0 = vpack.c.bf16 %v657_v63, %v655_v62 }
 0x3d1   :  { %726 = vmatmul.bf16.gmra.mxu1 %v670_v0 }
 0x3d4   :  { %v659_v3 = vpop.f32.mrf.mxu0 }
 0x3d5   :  { %v660_v61 = vadd.f32 %v659_v3, %v613_v44 }
 0x3dc   :  { %v661_v60 = vpop.f32.mrf.mxu0 }
 0x3dd   :  { %v662_v5 = vadd.f32 %v661_v60, %v614_v4  ;;  %v684_v4 = vmul.f32 0.0531441, %v1999_v36  ;;  %v685_v60 = vmul.f32 0.0531441, %v2001_v38 }
 0x3df   :  { %v671_v10 = vpack.c.bf16 %v662_v5, %v660_v61 }
 0x3e1   :  { %731 = vmatmul.bf16.gmra.mxu1 %v671_v10 }
 0x3ee   :  { %v697_v13 = vpop.f32.mrf.mxu1 }
 0x3ef   :  { %v698_v19 = vadd.f32 %v697_v13, %v672_v14 }
 0x3f6   :  { %v699_v18 = vpop.f32.mrf.mxu1 }
 0x3f7   :  { %v700_v1 = vadd.f32 %v699_v18, %v673_v15  ;;  %v686_v15 = vmul.f32 0.0531441, %v2009_v30  ;;  %v687_v18 = vmul.f32 0.0531441, %v2011_v50 }
 0x3f9   :  { %v737_v2 = vpack.c.bf16 %v700_v1, %v698_v19 }
 0x3fb   :  { %769 = vmatmul.bf16.vlgmr.msrb.gmra.mxu2 %v737_v2 }
 0x3fe   :  { %v702_v20 = vpop.f32.mrf.mxu1 }
 0x3ff   :  { %v703_v28 = vadd.f32 %v702_v20, %v674_v23 }
 0x406   :  { %v704_v27 = vpop.f32.mrf.mxu1 }
 0x407   :  { %v705_v31 = vadd.f32 %v704_v27, %v675_v26  ;;  %v745_v26 = vmul.f32 0.059049, %v1931_v24  ;;  %v746_v27 = vmul.f32 0.059049, %v1933_v25 }
 0x409   :  { %v738_v32 = vpack.c.bf16 %v705_v31, %v703_v28 }
 0x40b   :  { %774 = vmatmul.bf16.gmra.mxu2 %v738_v32 }
 0x40e   :  { %v707_v6 = vpop.f32.mrf.mxu1 }
 0x40f   :  { %v708_v45 = vadd.f32 %v707_v6, %v676_v7 }
 0x416   :  { %v709_v39 = vpop.f32.mrf.mxu1 }
 0x417   :  { %v710_v46 = vadd.f32 %v709_v39, %v677_v35  ;;  %v747_v35 = vmul.f32 0.059049, %v1943_v40  ;;  %v748_v39 = vmul.f32 0.059049, %v1945_v41 }
 0x419   :  { %v739_v29 = vpack.c.bf16 %v710_v46, %v708_v45 }
 0x41b   :  { %779 = vmatmul.bf16.gmra.mxu2 %v739_v29 }
 0x41e   :  { %v712_v47 = vpop.f32.mrf.mxu1 }
 0x41f   :  { %v713_v49 = vadd.f32 %v712_v47, %v678_v48 }
 0x426   :  { %v714_v12 = vpop.f32.mrf.mxu1 }
 0x427   :  { %v715_v33 = vadd.f32 %v714_v12, %v679_v11  ;;  %v749_v11 = vmul.f32 0.059049, %v1957_v51  ;;  %v750_v12 = vmul.f32 0.059049, %v1959_v52 }
 0x429   :  { %v740_v34 = vpack.c.bf16 %v715_v33, %v713_v49 }
 0x42b   :  { %784 = vmatmul.bf16.gmra.mxu2 %v740_v34 }
 0x42e   :  { %v717_v53 = vpop.f32.mrf.mxu1 }
 0x42f   :  { %v718_v55 = vadd.f32 %v717_v53, %v680_v37 }
 0x436   :  { %v719_v57 = vpop.f32.mrf.mxu1 }
 0x437   :  { %v720_v16 = vadd.f32 %v719_v57, %v681_v54  ;;  %v751_v54 = vmul.f32 0.059049, %v1969_v59  ;;  %v752_v57 = vmul.f32 0.059049, %v1971_v43 }
 0x439   :  { %v741_v42 = vpack.c.bf16 %v720_v16, %v718_v55 }
 0x43b   :  { %789 = vmatmul.bf16.gmra.mxu2 %v741_v42 }
 0x43e   :  { %v722_v17 = vpop.f32.mrf.mxu1 }
 0x43f   :  { %v723_v63 = vadd.f32 %v722_v17, %v682_v56 }
 0x446   :  { %v724_v62 = vpop.f32.mrf.mxu1 }
 0x447   :  { %v725_v0 = vadd.f32 %v724_v62, %v683_v58  ;;  %v753_v58 = vmul.f32 0.059049, %v1979_v8  ;;  %v754_v62 = vmul.f32 0.059049, %v1981_v9 }
 0x449   :  { %v742_v3 = vpack.c.bf16 %v725_v0, %v723_v63 }
 0x44b   :  { %794 = vmatmul.bf16.gmra.mxu2 %v742_v3 }
 0x44e   :  { %v727_v44 = vpop.f32.mrf.mxu1 }
 0x44f   :  { %v728_v5 = vadd.f32 %v727_v44, %v684_v4 }
 0x456   :  { %v729_v61 = vpop.f32.mrf.mxu1 }
 0x457   :  { %v730_v10 = vadd.f32 %v729_v61, %v685_v60  ;;  %v755_v60 = vmul.f32 0.059049, %v1989_v21  ;;  %v756_v61 = vmul.f32 0.059049, %v1991_v22 }
 0x459   :  { %v743_v13 = vpack.c.bf16 %v730_v10, %v728_v5 }
 0x45b   :  { %799 = vmatmul.bf16.gmra.mxu2 %v743_v13 }
 0x45e   :  { %v732_v14 = vpop.f32.mrf.mxu1 }
 0x45f   :  { %v733_v1 = vadd.f32 %v732_v14, %v686_v15 }
 0x466   :  { %v734_v19 = vpop.f32.mrf.mxu1 }
 0x467   :  { %v735_v2 = vadd.f32 %v734_v19, %v687_v18  ;;  %v757_v18 = vmul.f32 0.059049, %v1999_v36  ;;  %v758_v19 = vmul.f32 0.059049, %v2001_v38 }
 0x469   :  { %v744_v20 = vpack.c.bf16 %v735_v2, %v733_v1 }
 0x46b   :  { %804 = vmatmul.bf16.gmra.mxu2 %v744_v20 }
 0x47e   :  { %v770_v23 = vpop.f32.mrf.mxu2 }
 0x47f   :  { %v771_v31 = vadd.f32 %v770_v23, %v745_v26 }
 0x486   :  { %v772_v28 = vpop.f32.mrf.mxu2 }
 0x487   :  { %v773_v32 = vadd.f32 %v772_v28, %v746_v27  ;;  %v759_v27 = vmul.f32 0.059049, %v2009_v30  ;;  %v760_v28 = vmul.f32 0.059049, %v2011_v50 }
 0x489   :  { %v810_v6 = vpack.c.bf16 %v773_v32, %v771_v31 }
 0x48b   :  { %842 = vmatmul.bf16.vlgmr.msrb.gmra.mxu3 %v810_v6 }
 0x48e   :  { %v775_v7 = vpop.f32.mrf.mxu2 }
 0x48f   :  { %v776_v46 = vadd.f32 %v775_v7, %v747_v35 }
 0x496   :  { %v777_v45 = vpop.f32.mrf.mxu2 }
 0x497   :  { %v778_v29 = vadd.f32 %v777_v45, %v748_v39  ;;  %v818_v39 = vmul.f32 0.06561, %v1931_v24  ;;  %v819_v45 = vmul.f32 0.06561, %v1933_v25 }
 0x499   :  { %v811_v47 = vpack.c.bf16 %v778_v29, %v776_v46 }
 0x49b   :  { %847 = vmatmul.bf16.gmra.mxu3 %v811_v47 }
 0x49e   :  { %v780_v48 = vpop.f32.mrf.mxu2 }
 0x49f   :  { %v781_v33 = vadd.f32 %v780_v48, %v749_v11 }
 0x4a6   :  { %v782_v49 = vpop.f32.mrf.mxu2 }
 0x4a7   :  { %v783_v34 = vadd.f32 %v782_v49, %v750_v12  ;;  %v820_v12 = vmul.f32 0.06561, %v1943_v40  ;;  %v821_v49 = vmul.f32 0.06561, %v1945_v41 }
 0x4a9   :  { %v812_v53 = vpack.c.bf16 %v783_v34, %v781_v33 }
 0x4ab   :  { %852 = vmatmul.bf16.gmra.mxu3 %v812_v53 }
 0x4ae   :  { %v785_v37 = vpop.f32.mrf.mxu2 }
 0x4af   :  { %v786_v16 = vadd.f32 %v785_v37, %v751_v54 }
 0x4b6   :  { %v787_v55 = vpop.f32.mrf.mxu2 }
 0x4b7   :  { %v788_v42 = vadd.f32 %v787_v55, %v752_v57  ;;  %v822_v57 = vmul.f32 0.06561, %v1957_v51  ;;  %v823_v55 = vmul.f32 0.06561, %v1959_v52 }
 0x4b9   :  { %v813_v17 = vpack.c.bf16 %v788_v42, %v786_v16 }
 0x4bb   :  { %857 = vmatmul.bf16.gmra.mxu3 %v813_v17 }
 0x4be   :  { %v790_v56 = vpop.f32.mrf.mxu2 }
 0x4bf   :  { %v791_v0 = vadd.f32 %v790_v56, %v753_v58 }
 0x4c6   :  { %v792_v63 = vpop.f32.mrf.mxu2 }
 0x4c7   :  { %v793_v3 = vadd.f32 %v792_v63, %v754_v62  ;;  %v824_v62 = vmul.f32 0.06561, %v1969_v59  ;;  %v825_v63 = vmul.f32 0.06561, %v1971_v43 }
 0x4c9   :  { %v814_v44 = vpack.c.bf16 %v793_v3, %v791_v0 }
 0x4cb   :  { %862 = vmatmul.bf16.gmra.mxu3 %v814_v44 }
 0x4ce   :  { %v795_v4 = vpop.f32.mrf.mxu2 }
 0x4cf   :  { %v796_v10 = vadd.f32 %v795_v4, %v755_v60 }
 0x4d6   :  { %v797_v5 = vpop.f32.mrf.mxu2 }
 0x4d7   :  { %v798_v13 = vadd.f32 %v797_v5, %v756_v61  ;;  %v826_v61 = vmul.f32 0.06561, %v1979_v8  ;;  %v827_v5 = vmul.f32 0.06561, %v1981_v9 }
 0x4d9   :  { %v815_v14 = vpack.c.bf16 %v798_v13, %v796_v10 }
 0x4db   :  { %867 = vmatmul.bf16.gmra.mxu3 %v815_v14 }
 0x4de   :  { %v800_v15 = vpop.f32.mrf.mxu2 }
 0x4df   :  { %v801_v2 = vadd.f32 %v800_v15, %v757_v18 }
 0x4e6   :  { %v802_v1 = vpop.f32.mrf.mxu2 }
 0x4e7   :  { %v803_v20 = vadd.f32 %v802_v1, %v758_v19  ;;  %v828_v19 = vmul.f32 0.06561, %v1989_v21  ;;  %v829_v1 = vmul.f32 0.06561, %v1991_v22 }
 0x4e9   :  { %v816_v23 = vpack.c.bf16 %v803_v20, %v801_v2 }
 0x4eb   :  { %872 = vmatmul.bf16.gmra.mxu3 %v816_v23 }
 0x4ee   :  { %v805_v26 = vpop.f32.mrf.mxu2 }
 0x4ef   :  { %v806_v32 = vadd.f32 %v805_v26, %v759_v27 }
 0x4f6   :  { %v807_v31 = vpop.f32.mrf.mxu2 }
 0x4f7   :  { %v808_v6 = vadd.f32 %v807_v31, %v760_v28  ;;  %v830_v28 = vmul.f32 0.06561, %v1999_v36  ;;  %v831_v31 = vmul.f32 0.06561, %v2001_v38 }
 0x4f9   :  { %v817_v7 = vpack.c.bf16 %v808_v6, %v806_v32 }
 0x4fb   :  { %877 = vmatmul.bf16.gmra.mxu3 %v817_v7 }
 0x50e   :  { %v843_v35 = vpop.f32.mrf.mxu3 }
 0x50f   :  { %v844_v29 = vadd.f32 %v843_v35, %v818_v39 }
 0x516   :  { %v845_v46 = vpop.f32.mrf.mxu3 }
 0x517   :  { %v846_v47 = vadd.f32 %v845_v46, %v819_v45  ;;  %v832_v45 = vmul.f32 0.06561, %v2009_v30  ;;  %v833_v46 = vmul.f32 0.06561, %v2011_v50 }
 0x519   :  { %v883_v48 = vpack.c.bf16 %v846_v47, %v844_v29 }
 0x51b   :  { %915 = vmatmul.bf16.vlgmr.msra.gmra.mxu0 %v883_v48 }
 0x51e   :  { %v848_v11 = vpop.f32.mrf.mxu3 }
 0x51f   :  { %v849_v34 = vadd.f32 %v848_v11, %v820_v12 }
 0x526   :  { %v850_v33 = vpop.f32.mrf.mxu3 }
 0x527   :  { %v851_v53 = vadd.f32 %v850_v33, %v821_v49  ;;  %v891_v49 = vmul.f32 0.0729, %v1931_v24  ;;  %v892_v33 = vmul.f32 0.0729, %v1933_v25 }
 0x529   :  { %v884_v37 = vpack.c.bf16 %v851_v53, %v849_v34 }
 0x52b   :  { %920 = vmatmul.bf16.gmra.mxu0 %v884_v37 }
 0x52e   :  { %v853_v54 = vpop.f32.mrf.mxu3 }
 0x52f   :  { %v854_v42 = vadd.f32 %v853_v54, %v822_v57 }
 0x536   :  { %v855_v16 = vpop.f32.mrf.mxu3 }
 0x537   :  { %v856_v17 = vadd.f32 %v855_v16, %v823_v55  ;;  %v893_v55 = vmul.f32 0.0729, %v1943_v40  ;;  %v894_v16 = vmul.f32 0.0729, %v1945_v41 }
 0x539   :  { %v885_v56 = vpack.c.bf16 %v856_v17, %v854_v42 }
 0x53b   :  { %925 = vmatmul.bf16.gmra.mxu0 %v885_v56 }
 0x53e   :  { %v858_v58 = vpop.f32.mrf.mxu3 }
 0x53f   :  { %v859_v3 = vadd.f32 %v858_v58, %v824_v62 }
 0x546   :  { %v860_v0 = vpop.f32.mrf.mxu3 }
 0x547   :  { %v861_v44 = vadd.f32 %v860_v0, %v825_v63  ;;  %v895_v63 = vmul.f32 0.0729, %v1957_v51  ;;  %v896_v0 = vmul.f32 0.0729, %v1959_v52 }
 0x549   :  { %v886_v4 = vpack.c.bf16 %v861_v44, %v859_v3 }
 0x54b   :  { %930 = vmatmul.bf16.gmra.mxu0 %v886_v4 }
 0x54e   :  { %v863_v60 = vpop.f32.mrf.mxu3 }
 0x54f   :  { %v864_v13 = vadd.f32 %v863_v60, %v826_v61 }
 0x556   :  { %v865_v10 = vpop.f32.mrf.mxu3 }
 0x557   :  { %v866_v14 = vadd.f32 %v865_v10, %v827_v5  ;;  %v897_v5 = vmul.f32 0.0729, %v1969_v59  ;;  %v898_v10 = vmul.f32 0.0729, %v1971_v43 }
 0x559   :  { %v887_v15 = vpack.c.bf16 %v866_v14, %v864_v13 }
 0x55b   :  { %935 = vmatmul.bf16.gmra.mxu0 %v887_v15 }
 0x55e   :  { %v868_v18 = vpop.f32.mrf.mxu3 }
 0x55f   :  { %v869_v20 = vadd.f32 %v868_v18, %v828_v19 }
 0x566   :  { %v870_v2 = vpop.f32.mrf.mxu3 }
 0x567   :  { %v871_v23 = vadd.f32 %v870_v2, %v829_v1  ;;  %v899_v1 = vmul.f32 0.0729, %v1979_v8  ;;  %v900_v2 = vmul.f32 0.0729, %v1981_v9 }
 0x569   :  { %v888_v26 = vpack.c.bf16 %v871_v23, %v869_v20 }
 0x56b   :  { %940 = vmatmul.bf16.gmra.mxu0 %v888_v26 }
 0x56e   :  { %v873_v27 = vpop.f32.mrf.mxu3 }
 0x56f   :  { %v874_v6 = vadd.f32 %v873_v27, %v830_v28 }
 0x576   :  { %v875_v32 = vpop.f32.mrf.mxu3 }
 0x577   :  { %v876_v7 = vadd.f32 %v875_v32, %v831_v31  ;;  %v901_v31 = vmul.f32 0.0729, %v1989_v21  ;;  %v902_v32 = vmul.f32 0.0729, %v1991_v22 }
 0x579   :  { %v889_v35 = vpack.c.bf16 %v876_v7, %v874_v6 }
 0x57b   :  { %945 = vmatmul.bf16.gmra.mxu0 %v889_v35 }
 0x57e   :  { %v878_v39 = vpop.f32.mrf.mxu3 }
 0x57f   :  { %v879_v47 = vadd.f32 %v878_v39, %v832_v45 }
 0x586   :  { %v880_v29 = vpop.f32.mrf.mxu3 }
 0x587   :  { %v881_v48 = vadd.f32 %v880_v29, %v833_v46  ;;  %v903_v46 = vmul.f32 0.0729, %v1999_v36  ;;  %v904_v29 = vmul.f32 0.0729, %v2001_v38 }
 0x589   :  { %v890_v11 = vpack.c.bf16 %v881_v48, %v879_v47 }
 0x58b   :  { %950 = vmatmul.bf16.gmra.mxu0 %v890_v11 }
 0x598   :  { %v916_v12 = vpop.f32.mrf.mxu0 }
 0x599   :  { %v917_v53 = vadd.f32 %v916_v12, %v891_v49 }
 0x5a0   :  { %v918_v34 = vpop.f32.mrf.mxu0 }
 0x5a1   :  { %v919_v37 = vadd.f32 %v918_v34, %v892_v33  ;;  %v905_v33 = vmul.f32 0.0729, %v2009_v30  ;;  %v906_v34 = vmul.f32 0.0729, %v2011_v50 }
 0x5a3   :  { %v956_v54 = vpack.c.bf16 %v919_v37, %v917_v53 }
 0x5a5   :  { %988 = vmatmul.bf16.vlgmr.msra.gmra.mxu1 %v956_v54 }
 0x5a8   :  { %v921_v57 = vpop.f32.mrf.mxu0 }
 0x5a9   :  { %v922_v17 = vadd.f32 %v921_v57, %v893_v55 }
 0x5b0   :  { %v923_v42 = vpop.f32.mrf.mxu0 }
 0x5b1   :  { %v924_v56 = vadd.f32 %v923_v42, %v894_v16  ;;  %v964_v16 = vmul.f32 0.081, %v1931_v24  ;;  %v965_v42 = vmul.f32 0.081, %v1933_v25 }
 0x5b3   :  { %v957_v58 = vpack.c.bf16 %v924_v56, %v922_v17 }
 0x5b5   :  { %993 = vmatmul.bf16.gmra.mxu1 %v957_v58 }
 0x5b8   :  { %v926_v62 = vpop.f32.mrf.mxu0 }
 0x5b9   :  { %v927_v44 = vadd.f32 %v926_v62, %v895_v63 }
 0x5c0   :  { %v928_v3 = vpop.f32.mrf.mxu0 }
 0x5c1   :  { %v929_v4 = vadd.f32 %v928_v3, %v896_v0  ;;  %v966_v0 = vmul.f32 0.081, %v1943_v40  ;;  %v967_v3 = vmul.f32 0.081, %v1945_v41 }
 0x5c3   :  { %v958_v60 = vpack.c.bf16 %v929_v4, %v927_v44 }
 0x5c5   :  { %998 = vmatmul.bf16.gmra.mxu1 %v958_v60 }
 0x5c8   :  { %v931_v61 = vpop.f32.mrf.mxu0 }
 0x5c9   :  { %v932_v14 = vadd.f32 %v931_v61, %v897_v5 }
 0x5d0   :  { %v933_v13 = vpop.f32.mrf.mxu0 }
 0x5d1   :  { %v934_v15 = vadd.f32 %v933_v13, %v898_v10  ;;  %v968_v10 = vmul.f32 0.081, %v1957_v51  ;;  %v969_v13 = vmul.f32 0.081, %v1959_v52 }
 0x5d3   :  { %v959_v18 = vpack.c.bf16 %v934_v15, %v932_v14 }
 0x5d5   :  { %1003 = vmatmul.bf16.gmra.mxu1 %v959_v18 }
 0x5d8   :  { %v936_v19 = vpop.f32.mrf.mxu0 }
 0x5d9   :  { %v937_v23 = vadd.f32 %v936_v19, %v899_v1 }
 0x5e0   :  { %v938_v20 = vpop.f32.mrf.mxu0 }
 0x5e1   :  { %v939_v26 = vadd.f32 %v938_v20, %v900_v2  ;;  %v970_v2 = vmul.f32 0.081, %v1969_v59  ;;  %v971_v20 = vmul.f32 0.081, %v1971_v43 }
 0x5e3   :  { %v960_v27 = vpack.c.bf16 %v939_v26, %v937_v23 }
 0x5e5   :  { %1008 = vmatmul.bf16.gmra.mxu1 %v960_v27 }
 0x5e8   :  { %v941_v28 = vpop.f32.mrf.mxu0 }
 0x5e9   :  { %v942_v7 = vadd.f32 %v941_v28, %v901_v31 }
 0x5f0   :  { %v943_v6 = vpop.f32.mrf.mxu0 }
 0x5f1   :  { %v944_v35 = vadd.f32 %v943_v6, %v902_v32  ;;  %v972_v32 = vmul.f32 0.081, %v1979_v8  ;;  %v973_v6 = vmul.f32 0.081, %v1981_v9 }
 0x5f3   :  { %v961_v39 = vpack.c.bf16 %v944_v35, %v942_v7 }
 0x5f5   :  { %1013 = vmatmul.bf16.gmra.mxu1 %v961_v39 }
 0x5f8   :  { %v946_v45 = vpop.f32.mrf.mxu0 }
 0x5f9   :  { %v947_v48 = vadd.f32 %v946_v45, %v903_v46 }
 0x600   :  { %v948_v47 = vpop.f32.mrf.mxu0 }
 0x601   :  { %v949_v11 = vadd.f32 %v948_v47, %v904_v29  ;;  %v974_v29 = vmul.f32 0.081, %v1989_v21  ;;  %v975_v47 = vmul.f32 0.081, %v1991_v22 }
 0x603   :  { %v962_v12 = vpack.c.bf16 %v949_v11, %v947_v48 }
 0x605   :  { %1018 = vmatmul.bf16.gmra.mxu1 %v962_v12 }
 0x608   :  { %v951_v49 = vpop.f32.mrf.mxu0 }
 0x609   :  { %v952_v37 = vadd.f32 %v951_v49, %v905_v33 }
 0x610   :  { %v953_v53 = vpop.f32.mrf.mxu0 }
 0x611   :  { %v954_v54 = vadd.f32 %v953_v53, %v906_v34  ;;  %v976_v34 = vmul.f32 0.081, %v1999_v36  ;;  %v977_v53 = vmul.f32 0.081, %v2001_v38 }
 0x613   :  { %v963_v57 = vpack.c.bf16 %v954_v54, %v952_v37 }
 0x615   :  { %1023 = vmatmul.bf16.gmra.mxu1 %v963_v57 }
 0x622   :  { %v989_v55 = vpop.f32.mrf.mxu1 }
 0x623   :  { %v990_v56 = vadd.f32 %v989_v55, %v964_v16 }
 0x62a   :  { %v991_v17 = vpop.f32.mrf.mxu1 }
 0x62b   :  { %v992_v58 = vadd.f32 %v991_v17, %v965_v42  ;;  %v978_v42 = vmul.f32 0.081, %v2009_v30  ;;  %v979_v17 = vmul.f32 0.081, %v2011_v50 }
 0x62d   :  { %v1029_v62 = vpack.c.bf16 %v992_v58, %v990_v56 }
 0x62f   :  { %1061 = vmatmul.bf16.vlgmr.msra.gmra.mxu2 %v1029_v62 }
 0x632   :  { %v994_v63 = vpop.f32.mrf.mxu1 }
 0x633   :  { %v995_v4 = vadd.f32 %v994_v63, %v966_v0 }
 0x63a   :  { %v996_v44 = vpop.f32.mrf.mxu1 }
 0x63b   :  { %v997_v60 = vadd.f32 %v996_v44, %v967_v3  ;;  %v1037_v3 = vmul.f32 0.09, %v1931_v24  ;;  %v1038_v44 = vmul.f32 0.09, %v1933_v25 }
 0x63d   :  { %v1030_v61 = vpack.c.bf16 %v997_v60, %v995_v4 }
 0x63f   :  { %1066 = vmatmul.bf16.gmra.mxu2 %v1030_v61 }
 0x642   :  { %v999_v5 = vpop.f32.mrf.mxu1 }
 0x643   :  { %v1000_v15 = vadd.f32 %v999_v5, %v968_v10 }
 0x64a   :  { %v1001_v14 = vpop.f32.mrf.mxu1 }
 0x64b   :  { %v1002_v18 = vadd.f32 %v1001_v14, %v969_v13  ;;  %v1039_v13 = vmul.f32 0.09, %v1943_v40  ;;  %v1040_v14 = vmul.f32 0.09, %v1945_v41 }
 0x64d   :  { %v1031_v19 = vpack.c.bf16 %v1002_v18, %v1000_v15 }
 0x64f   :  { %1071 = vmatmul.bf16.gmra.mxu2 %v1031_v19 }
 0x652   :  { %v1004_v1 = vpop.f32.mrf.mxu1 }
 0x653   :  { %v1005_v26 = vadd.f32 %v1004_v1, %v970_v2 }
 0x65a   :  { %v1006_v23 = vpop.f32.mrf.mxu1 }
 0x65b   :  { %v1007_v27 = vadd.f32 %v1006_v23, %v971_v20  ;;  %v1041_v20 = vmul.f32 0.09, %v1957_v51  ;;  %v1042_v23 = vmul.f32 0.09, %v1959_v52 }
 0x65d   :  { %v1032_v28 = vpack.c.bf16 %v1007_v27, %v1005_v26 }
 0x65f   :  { %1076 = vmatmul.bf16.gmra.mxu2 %v1032_v28 }
 0x662   :  { %v1009_v31 = vpop.f32.mrf.mxu1 }
 0x663   :  { %v1010_v35 = vadd.f32 %v1009_v31, %v972_v32 }
 0x66a   :  { %v1011_v7 = vpop.f32.mrf.mxu1 }
 0x66b   :  { %v1012_v39 = vadd.f32 %v1011_v7, %v973_v6  ;;  %v1043_v6 = vmul.f32 0.09, %v1969_v59  ;;  %v1044_v7 = vmul.f32 0.09, %v1971_v43 }
 0x66d   :  { %v1033_v45 = vpack.c.bf16 %v1012_v39, %v1010_v35 }
 0x66f   :  { %1081 = vmatmul.bf16.gmra.mxu2 %v1033_v45 }
 0x672   :  { %v1014_v46 = vpop.f32.mrf.mxu1 }
 0x673   :  { %v1015_v11 = vadd.f32 %v1014_v46, %v974_v29 }
 0x67a   :  { %v1016_v48 = vpop.f32.mrf.mxu1 }
 0x67b   :  { %v1017_v12 = vadd.f32 %v1016_v48, %v975_v47  ;;  %v1045_v47 = vmul.f32 0.09, %v1979_v8  ;;  %v1046_v48 = vmul.f32 0.09, %v1981_v9 }
 0x67d   :  { %v1034_v49 = vpack.c.bf16 %v1017_v12, %v1015_v11 }
 0x67f   :  { %1086 = vmatmul.bf16.gmra.mxu2 %v1034_v49 }
 0x682   :  { %v1019_v33 = vpop.f32.mrf.mxu1 }
 0x683   :  { %v1020_v54 = vadd.f32 %v1019_v33, %v976_v34 }
 0x68a   :  { %v1021_v37 = vpop.f32.mrf.mxu1 }
 0x68b   :  { %v1022_v57 = vadd.f32 %v1021_v37, %v977_v53  ;;  %v1047_v53 = vmul.f32 0.09, %v1989_v21  ;;  %v1048_v37 = vmul.f32 0.09, %v1991_v22 }
 0x68d   :  { %v1035_v55 = vpack.c.bf16 %v1022_v57, %v1020_v54 }
 0x68f   :  { %1091 = vmatmul.bf16.gmra.mxu2 %v1035_v55 }
 0x692   :  { %v1024_v16 = vpop.f32.mrf.mxu1 }
 0x693   :  { %v1025_v58 = vadd.f32 %v1024_v16, %v978_v42 }
 0x69a   :  { %v1026_v56 = vpop.f32.mrf.mxu1 }
 0x69b   :  { %v1027_v62 = vadd.f32 %v1026_v56, %v979_v17  ;;  %v1049_v17 = vmul.f32 0.09, %v1999_v36  ;;  %v1050_v56 = vmul.f32 0.09, %v2001_v38 }
 0x69d   :  { %v1036_v63 = vpack.c.bf16 %v1027_v62, %v1025_v58 }
 0x69f   :  { %1096 = vmatmul.bf16.gmra.mxu2 %v1036_v63 }
 0x6b2   :  { %v1062_v0 = vpop.f32.mrf.mxu2 }
 0x6b3   :  { %v1063_v60 = vadd.f32 %v1062_v0, %v1037_v3 }
 0x6ba   :  { %v1064_v4 = vpop.f32.mrf.mxu2 }
 0x6bb   :  { %v1065_v61 = vadd.f32 %v1064_v4, %v1038_v44  ;;  %v1051_v44 = vmul.f32 0.09, %v2009_v30  ;;  %v1052_v4 = vmul.f32 0.09, %v2011_v50 }
 0x6bd   :  { %v1102_v5 = vpack.c.bf16 %v1065_v61, %v1063_v60 }
 0x6bf   :  { %1134 = vmatmul.bf16.vlgmr.msra.gmra.mxu3 %v1102_v5 }
 0x6c2   :  { %v1067_v10 = vpop.f32.mrf.mxu2 }
 0x6c3   :  { %v1068_v18 = vadd.f32 %v1067_v10, %v1039_v13  ;;  %v1110_v13 = vmul.f32 0.1, %v1931_v24  ;;  %v1114_v24 = vmul.f32 0.1, %v1957_v51  ;;  %v1118_v51 = vmul.f32 0.1, %v1979_v8 }
 0x6c4   :  { %v1122_v8 = vmul.f32 0.1, %v1999_v36 }
 0x6ca   :  { %v1069_v15 = vpop.f32.mrf.mxu2 }
 0x6cb   :  { %v1070_v19 = vadd.f32 %v1069_v15, %v1040_v14 }
 0x6cd   :  { %v1103_v1 = vpack.c.bf16 %v1070_v19, %v1068_v18  ;;  %v1111_v18 = vmul.f32 0.1, %v1933_v25  ;;  %v1115_v25 = vmul.f32 0.1, %v1959_v52  ;;  %v1119_v52 = vmul.f32 0.1, %v1981_v9 }
 0x6ce   :  { %v1123_v9 = vmul.f32 0.1, %v2001_v38 }
 0x6cf   :  { %1139 = vmatmul.bf16.gmra.mxu3 %v1103_v1 }
 0x6d2   :  { %v1072_v2 = vpop.f32.mrf.mxu2 }
 0x6d3   :  { %v1073_v27 = vadd.f32 %v1072_v2, %v1041_v20  ;;  %v1112_v2 = vmul.f32 0.1, %v1943_v40  ;;  %v1116_v40 = vmul.f32 0.1, %v1969_v59  ;;  %v1120_v59 = vmul.f32 0.1, %v1989_v21 }
 0x6d4   :  { %v1124_v21 = vmul.f32 0.1, %v2009_v30 }
 0x6da   :  { %v1074_v26 = vpop.f32.mrf.mxu2 }
 0x6db   :  { %v1075_v28 = vadd.f32 %v1074_v26, %v1042_v23  ;;  %v1113_v26 = vmul.f32 0.1, %v1945_v41  ;;  %v1117_v41 = vmul.f32 0.1, %v1971_v43  ;;  %v1121_v43 = vmul.f32 0.1, %v1991_v22 }
 0x6dc   :  { %v1125_v22 = vmul.f32 0.1, %v2011_v50 }
 0x6dd   :  { %v1104_v31 = vpack.c.bf16 %v1075_v28, %v1073_v27 }
 0x6df   :  { %1144 = vmatmul.bf16.gmra.mxu3 %v1104_v31 }
 0x6e2   :  { %v1077_v32 = vpop.f32.mrf.mxu2 }
 0x6e3   :  { %v1078_v39 = vadd.f32 %v1077_v32, %v1043_v6 }
 0x6ea   :  { %v1079_v35 = vpop.f32.mrf.mxu2 }
 0x6eb   :  { %v1080_v45 = vadd.f32 %v1079_v35, %v1044_v7 }
 0x6ed   :  { %v1105_v46 = vpack.c.bf16 %v1080_v45, %v1078_v39 }
 0x6ef   :  { %1149 = vmatmul.bf16.gmra.mxu3 %v1105_v46 }
 0x6f2   :  { %v1082_v29 = vpop.f32.mrf.mxu2 }
 0x6f3   :  { %v1083_v12 = vadd.f32 %v1082_v29, %v1045_v47 }
 0x6fa   :  { %v1084_v11 = vpop.f32.mrf.mxu2 }
 0x6fb   :  { %v1085_v49 = vadd.f32 %v1084_v11, %v1046_v48 }
 0x6fd   :  { %v1106_v33 = vpack.c.bf16 %v1085_v49, %v1083_v12 }
 0x6ff   :  { %1154 = vmatmul.bf16.gmra.mxu3 %v1106_v33 }
 0x702   :  { %v1087_v34 = vpop.f32.mrf.mxu2 }
 0x703   :  { %v1088_v57 = vadd.f32 %v1087_v34, %v1047_v53 }
 0x70a   :  { %v1089_v54 = vpop.f32.mrf.mxu2 }
 0x70b   :  { %v1090_v55 = vadd.f32 %v1089_v54, %v1048_v37 }
 0x70d   :  { %v1107_v16 = vpack.c.bf16 %v1090_v55, %v1088_v57 }
 0x70f   :  { %1159 = vmatmul.bf16.gmra.mxu3 %v1107_v16 }
 0x712   :  { %v1092_v42 = vpop.f32.mrf.mxu2 }
 0x713   :  { %v1093_v62 = vadd.f32 %v1092_v42, %v1049_v17 }
 0x71a   :  { %v1094_v58 = vpop.f32.mrf.mxu2 }
 0x71b   :  { %v1095_v63 = vadd.f32 %v1094_v58, %v1050_v56 }
 0x71d   :  { %v1108_v0 = vpack.c.bf16 %v1095_v63, %v1093_v62 }
 0x71f   :  { %1164 = vmatmul.bf16.gmra.mxu3 %v1108_v0 }
 0x722   :  { %v1097_v3 = vpop.f32.mrf.mxu2 }
 0x723   :  { %v1098_v61 = vadd.f32 %v1097_v3, %v1051_v44 }
 0x72a   :  { %v1099_v60 = vpop.f32.mrf.mxu2 }
 0x72b   :  { %v1100_v5 = vadd.f32 %v1099_v60, %v1052_v4 }
 0x72d   :  { %v1109_v10 = vpack.c.bf16 %v1100_v5, %v1098_v61 }
 0x72f   :  { %1169 = vmatmul.bf16.gmra.mxu3 %v1109_v10 }
 0x742   :  { %v1135_v14 = vpop.f32.mrf.mxu3 }
 0x743   :  { %v1136_v15 = vadd.f32 %v1135_v14, %v1110_v13  ;;  %v1255_v14 = vlaneseq }
 0x745   :  { %1175 = vxpose.xlu1.b32.start [1/16] %v1136_v15, 128 }
 0x74a   :  { %v1137_v19 = vpop.f32.mrf.mxu3 }
 0x74b   :  { %v1138_v1 = vadd.f32 %v1137_v19, %v1111_v18  ;;  %v2192_v19 = vand.u32 127, %v1255_v14 }
 0x74d   :  { %1176 = vxpose.xlu1.b32.cont [2/16] %v1138_v1, 128  ;;  %vm1257_vm2 = vcmp.lt.s32.totalorder %v2192_v19, 8 }
 0x752   :  { %v1140_v20 = vpop.f32.mrf.mxu3 }
 0x753   :  { %v1141_v23 = vadd.f32 %v1140_v20, %v1112_v2 }
 0x755   :  { %1177 = vxpose.xlu1.b32.cont [3/16] %v1141_v23, 128 }
 0x75a   :  { %v1142_v27 = vpop.f32.mrf.mxu3 }
 0x75b   :  { %v1143_v28 = vadd.f32 %v1142_v27, %v1113_v26 }
 0x75d   :  { %1178 = vxpose.xlu1.b32.cont [4/16] %v1143_v28, 128 }
 0x762   :  { %v1145_v31 = vpop.f32.mrf.mxu3 }
 0x763   :  { %v1146_v32 = vadd.f32 %v1145_v31, %v1114_v24 }
 0x765   :  { %1179 = vxpose.xlu1.b32.cont [5/16] %v1146_v32, 128 }
 0x76a   :  { %v1147_v6 = vpop.f32.mrf.mxu3 }
 0x76b   :  { %v1148_v7 = vadd.f32 %v1147_v6, %v1115_v25 }
 0x76d   :  { %1180 = vxpose.xlu1.b32.cont [6/16] %v1148_v7, 128 }
 0x772   :  { %v1150_v35 = vpop.f32.mrf.mxu3 }
 0x773   :  { %v1151_v39 = vadd.f32 %v1150_v35, %v1116_v40 }
 0x775   :  { %1181 = vxpose.xlu1.b32.cont [7/16] %v1151_v39, 128 }
 0x77a   :  { %v1152_v45 = vpop.f32.mrf.mxu3 }
 0x77b   :  { %v1153_v46 = vadd.f32 %v1152_v45, %v1117_v41 }
 0x77d   :  { %1182 = vxpose.xlu1.b32.cont [8/16] %v1153_v46, 128 }
 0x782   :  { %v1155_v29 = vpop.f32.mrf.mxu3 }
 0x783   :  { %v1156_v47 = vadd.f32 %v1155_v29, %v1118_v51 }
 0x785   :  { %1183 = vxpose.xlu1.b32.cont [9/16] %v1156_v47, 128 }
 0x78a   :  { %v1157_v48 = vpop.f32.mrf.mxu3 }
 0x78b   :  { %v1158_v11 = vadd.f32 %v1157_v48, %v1119_v52 }
 0x78d   :  { %1184 = vxpose.xlu1.b32.cont [10/16] %v1158_v11, 128 }
 0x792   :  { %v1160_v12 = vpop.f32.mrf.mxu3 }
 0x793   :  { %v1161_v49 = vadd.f32 %v1160_v12, %v1120_v59 }
 0x795   :  { %1185 = vxpose.xlu1.b32.cont [11/16] %v1161_v49, 128 }
 0x79a   :  { %v1162_v33 = vpop.f32.mrf.mxu3 }
 0x79b   :  { %v1163_v34 = vadd.f32 %v1162_v33, %v1121_v43 }
 0x79d   :  { %1186 = vxpose.xlu1.b32.cont [12/16] %v1163_v34, 128 }
 0x7a2   :  { %v1165_v53 = vpop.f32.mrf.mxu3 }
 0x7a3   :  { %v1166_v37 = vadd.f32 %v1165_v53, %v1122_v8 }
 0x7a5   :  { %1187 = vxpose.xlu1.b32.cont [13/16] %v1166_v37, 128 }
 0x7aa   :  { %v1167_v54 = vpop.f32.mrf.mxu3 }
 0x7ab   :  { %v1168_v57 = vadd.f32 %v1167_v54, %v1123_v9 }
 0x7ad   :  { %1188 = vxpose.xlu1.b32.cont [14/16] %v1168_v57, 128 }
 0x7b2   :  { %v1170_v55 = vpop.f32.mrf.mxu3 }
 0x7b3   :  { %v1171_v16 = vadd.f32 %v1170_v55, %v1124_v21 }
 0x7b5   :  { %1189 = vxpose.xlu1.b32.cont [15/16] %v1171_v16, 128 }
 0x7ba   :  { %v1172_v42 = vpop.f32.mrf.mxu3 }
 0x7bb   :  { %v1173_v17 = vadd.f32 %v1172_v42, %v1125_v22 }
 0x7bd   :  { %1190 = vxpose.xlu1.b32.end [16/16] %v1173_v17, 128 }
 0x7e9   :  { %v1191_v56 = vpop.trf.xlu1 }
 0x7ea   :  { %1207 = vmax.xlane.f32.xlu2 %v1191_v56 }
 0x7f1   :  { %v1192_v36 = vpop.trf.xlu1 }
 0x7f2   :  { %1209 = vmax.xlane.f32.xlu2 %v1192_v36 }
 0x7f9   :  { %v1193_v58 = vpop.trf.xlu1 }
 0x7fa   :  { %1211 = vmax.xlane.f32.xlu2 %v1193_v58 }
 0x801   :  { %v1194_v38 = vpop.trf.xlu1 }
 0x802   :  { %1213 = vmax.xlane.f32.xlu2 %v1194_v38 }
 0x809   :  { %v1195_v62 = vpop.trf.xlu1 }
 0x80a   :  { %1215 = vmax.xlane.f32.xlu2 %v1195_v62 }
 0x811   :  { %v1196_v63 = vpop.trf.xlu1 }
 0x812   :  { %1217 = vmax.xlane.f32.xlu2 %v1196_v63 }
 0x819   :  { %v2159_v30 = vpop.trf.xlu1 }
 0x81a   :  { %1219 = vmax.xlane.f32.xlu2 %v2159_v30 }
 0x821   :  { %v2162_v50 = vpop.trf.xlu1 }
 0x822   :  { %1221 = vmax.xlane.f32.xlu2 %v2162_v50 }
 0x829   :  { %v2165_v0 = vpop.trf.xlu1 }
 0x82a   :  { %1223 = vmax.xlane.f32.xlu2 %v2165_v0 }
 0x831   :  { %v2168_v3 = vpop.trf.xlu1 }
 0x832   :  { %1225 = vmax.xlane.f32.xlu2 %v2168_v3 }
 0x839   :  { %v2171_v44 = vpop.trf.xlu1 }
 0x83a   :  { %1227 = vmax.xlane.f32.xlu2 %v2171_v44 }
 0x841   :  { %v2174_v4 = vpop.trf.xlu1 }
 0x842   :  { %1229 = vmax.xlane.f32.xlu2 %v2174_v4 }
 0x849   :  { %v2177_v60 = vpop.trf.xlu1 }
 0x84a   :  { %1231 = vmax.xlane.f32.xlu2 %v2177_v60 }
 0x851   :  { %v2180_v61 = vpop.trf.xlu1 }
 0x852   :  { %1233 = vmax.xlane.f32.xlu2 %v2180_v61 }
 0x859   :  { %v2183_v5 = vpop.trf.xlu1 }
 0x85a   :  { %1235 = vmax.xlane.f32.xlu2 %v2183_v5 }
 0x85d   :  { %v1208_v10 = vpop.xlane.xlu2 %1207 }
 0x85e   :  { %v2186_v13 = vsub.f32 %v1191_v56, %v1208_v10 }
 0x860   :  { %v1258_v15 = vmul.f32 1.442695, %v2186_v13 }
 0x861   :  { %v2189_v18 = vpop.trf.xlu1 }
 0x862   :  { %1540 = vpow2.f32 %v1258_v15  ;;  %1237 = vmax.xlane.f32.xlu2 %v2189_v18 }
 0x865   :  { %v1210_v1 = vpop.xlane.xlu2 %1209 }
 0x866   :  { %v2194_v2 = vsub.f32 %v1192_v36, %v1210_v1 }
 0x868   :  { %v1541_v20 = vpop.eup %1540  ;;  %v1260_v23 = vmul.f32 1.442695, %v2194_v2 }
 0x869   :  { %v1290_v26 = vsel %vm1257_vm2, %v1541_v20, 0.0 }
 0x86a   :  { %1542 = vpow2.f32 %v1260_v23  ;;  %1306 = vadd.xlane.f32.xlu0 %v1290_v26 }
 0x86d   :  { %v1212_v27 = vpop.xlane.xlu2 %1211 }
 0x86e   :  { %v2200_v28 = vsub.f32 %v1193_v58, %v1212_v27 }
 0x870   :  { %v1543_v24 = vpop.eup %1542  ;;  %v1262_v31 = vmul.f32 1.442695, %v2200_v28 }
 0x871   :  { %v1291_v32 = vsel %vm1257_vm2, %v1543_v24, 0.0 }
 0x872   :  { %1544 = vpow2.f32 %v1262_v31  ;;  %1308 = vadd.xlane.f32.xlu1 %v1291_v32 }
 0x875   :  { %v1214_v25 = vpop.xlane.xlu2 %1213 }
 0x876   :  { %v2205_v6 = vsub.f32 %v1194_v38, %v1214_v25 }
 0x878   :  { %v1545_v7 = vpop.eup %1544  ;;  %v1264_v40 = vmul.f32 1.442695, %v2205_v6 }
 0x879   :  { %v1292_v35 = vsel %vm1257_vm2, %v1545_v7, 0.0 }
 0x87a   :  { %1546 = vpow2.f32 %v1264_v40  ;;  %1310 = vadd.xlane.f32.xlu2 %v1292_v35 }
 0x87d   :  { %v1216_v39 = vpop.xlane.xlu2 %1215 }
 0x87e   :  { %v2210_v41 = vsub.f32 %v1195_v62, %v1216_v39 }
 0x880   :  { %v1547_v45 = vpop.eup %1546  ;;  %v1266_v46 = vmul.f32 1.442695, %v2210_v41 }
 0x881   :  { %v1293_v51 = vsel %vm1257_vm2, %v1547_v45, 0.0 }
 0x882   :  { %1548 = vpow2.f32 %v1266_v46  ;;  %1312 = vadd.xlane.f32.xlu2 %v1293_v51 }
 0x885   :  { %v1218_v29 = vpop.xlane.xlu2 %1217 }
 0x886   :  { %v2215_v47 = vsub.f32 %v1196_v63, %v1218_v29 }
 0x888   :  { %v1549_v52 = vpop.eup %1548  ;;  %v1268_v48 = vmul.f32 1.442695, %v2215_v47 }
 0x889   :  { %v1294_v11 = vsel %vm1257_vm2, %v1549_v52, 0.0 }
 0x88a   :  { %1550 = vpow2.f32 %v1268_v48  ;;  %1314 = vadd.xlane.f32.xlu2 %v1294_v11 }
 0x88d   :  { %v1220_v59 = vpop.xlane.xlu2 %1219 }
 0x88e   :  { %v2221_v12 = vsub.f32 %v2159_v30, %v1220_v59 }
 0x890   :  { %v1551_v49 = vpop.eup %1550  ;;  %v1270_v43 = vmul.f32 1.442695, %v2221_v12 }
 0x891   :  { %v1295_v33 = vsel %vm1257_vm2, %v1551_v49, 0.0 }
 0x892   :  { %1552 = vpow2.f32 %v1270_v43  ;;  %1316 = vadd.xlane.f32.xlu2 %v1295_v33 }
 0x895   :  { %v1222_v34 = vpop.xlane.xlu2 %1221 }
 0x896   :  { %v2227_v8 = vsub.f32 %v2162_v50, %v1222_v34 }
 0x898   :  { %v1553_v53 = vpop.eup %1552  ;;  %v1272_v37 = vmul.f32 1.442695, %v2227_v8 }
 0x899   :  { %v1296_v9 = vsel %vm1257_vm2, %v1553_v53, 0.0 }
 0x89a   :  { %1554 = vpow2.f32 %v1272_v37  ;;  %1318 = vadd.xlane.f32.xlu2 %v1296_v9 }
 0x89d   :  { %v1224_v54 = vpop.xlane.xlu2 %1223 }
 0x89e   :  { %v2233_v57 = vsub.f32 %v2165_v0, %v1224_v54 }
 0x8a0   :  { %v1555_v21 = vpop.eup %1554  ;;  %v1274_v55 = vmul.f32 1.442695, %v2233_v57 }
 0x8a1   :  { %v1297_v16 = vsel %vm1257_vm2, %v1555_v21, 0.0 }
 0x8a2   :  { %1556 = vpow2.f32 %v1274_v55  ;;  %1320 = vadd.xlane.f32.xlu2 %v1297_v16 }
 0x8a5   :  { %v1226_v22 = vpop.xlane.xlu2 %1225 }
 0x8a6   :  { %v2239_v42 = vsub.f32 %v2168_v3, %v1226_v22 }
 0x8a8   :  { %v1557_v17 = vpop.eup %1556  ;;  %v1276_v56 = vmul.f32 1.442695, %v2239_v42 }
 0x8a9   :  { %v1298_v36 = vsel %vm1257_vm2, %v1557_v17, 0.0 }
 0x8aa   :  { %1558 = vpow2.f32 %v1276_v56  ;;  %1322 = vadd.xlane.f32.xlu2 %v1298_v36 }
 0x8ad   :  { %v1228_v58 = vpop.xlane.xlu2 %1227 }
 0x8ae   :  { %v2245_v38 = vsub.f32 %v2171_v44, %v1228_v58 }
 0x8b0   :  { %v1559_v62 = vpop.eup %1558  ;;  %v1278_v63 = vmul.f32 1.442695, %v2245_v38 }
 0x8b1   :  { %v1299_v30 = vsel %vm1257_vm2, %v1559_v62, 0.0 }
 0x8b2   :  { %1560 = vpow2.f32 %v1278_v63  ;;  %1324 = vadd.xlane.f32.xlu2 %v1299_v30 }
 0x8b5   :  { %v1230_v50 = vpop.xlane.xlu2 %1229 }
 0x8b6   :  { %v2251_v0 = vsub.f32 %v2174_v4, %v1230_v50 }
 0x8b8   :  { %v1561_v3 = vpop.eup %1560  ;;  %v1280_v10 = vmul.f32 1.442695, %v2251_v0 }
 0x8b9   :  { %v1300_v14 = vsel %vm1257_vm2, %v1561_v3, 0.0 }
 0x8ba   :  { %1562 = vpow2.f32 %v1280_v10  ;;  %1326 = vadd.xlane.f32.xlu2 %v1300_v14 }
 0x8bd   :  { %v1232_v44 = vpop.xlane.xlu2 %1231 }
 0x8be   :  { %v2257_v15 = vsub.f32 %v2177_v60, %v1232_v44 }
 0x8c0   :  { %v1563_v1 = vpop.eup %1562  ;;  %v1282_v20 = vmul.f32 1.442695, %v2257_v15 }
 0x8c1   :  { %v1301_v23 = vsel %vm1257_vm2, %v1563_v1, 0.0 }
 0x8c2   :  { %1564 = vpow2.f32 %v1282_v20  ;;  %1328 = vadd.xlane.f32.xlu2 %v1301_v23 }
 0x8c5   :  { %v1234_v4 = vpop.xlane.xlu2 %1233 }
 0x8c6   :  { %v2263_v26 = vsub.f32 %v2180_v61, %v1234_v4 }
 0x8c8   :  { %v1565_v27 = vpop.eup %1564  ;;  %v1284_v24 = vmul.f32 1.442695, %v2263_v26 }
 0x8c9   :  { %v1302_v31 = vsel %vm1257_vm2, %v1565_v27, 0.0 }
 0x8ca   :  { %1566 = vpow2.f32 %v1284_v24  ;;  %1330 = vadd.xlane.f32.xlu2 %v1302_v31 }
 0x8cd   :  { %v1236_v60 = vpop.xlane.xlu2 %1235 }
 0x8ce   :  { %v2269_v32 = vsub.f32 %v2183_v5, %v1236_v60 }
 0x8d0   :  { %v1567_v25 = vpop.eup %1566  ;;  %v1286_v7 = vmul.f32 1.442695, %v2269_v32 }
 0x8d1   :  { %v1303_v40 = vsel %vm1257_vm2, %v1567_v25, 0.0 }
 0x8d2   :  { %1568 = vpow2.f32 %v1286_v7  ;;  %1332 = vadd.xlane.f32.xlu2 %v1303_v40 }
 0x8d5   :  { %v1238_v61 = vpop.xlane.xlu2 %1237 }
 0x8d6   :  { %v2275_v35 = vsub.f32 %v2189_v18, %v1238_v61 }
 0x8d8   :  { %v1569_v39 = vpop.eup %1568  ;;  %v1288_v45 = vmul.f32 1.442695, %v2275_v35 }
 0x8d9   :  { %v1304_v46 = vsel %vm1257_vm2, %v1569_v39, 0.0 }
 0x8da   :  { %1570 = vpow2.f32 %v1288_v45  ;;  %1334 = vadd.xlane.f32.xlu1 %v1304_v46 }
 0x8dd   :  { %v1307_v5 = vpop.xlane.xlu0 %1306 }
 0x8de   :  { %1572 = vlog2.f32 %v1307_v5 }
 0x8e0   :  { %v1571_v51 = vpop.eup %1570 }
 0x8e1   :  { %v1305_v29 = vsel %vm1257_vm2, %v1571_v51, 0.0 }
 0x8e2   :  { %1336 = vadd.xlane.f32.xlu2 %v1305_v29 }
 0x8e4   :  { %v1573_v52 = vpop.eup %1572 }
 0x8e5   :  { %v1339_v48 = vmul.f32 0.6931472, %v1573_v52  ;;  %v1309_v11 = vpop.xlane.xlu1 %1308 }
 0x8e6   :  { %1574 = vlog2.f32 %v1309_v11 }
 0x8e7   :  { %v1370_v18 = vsub.f32 %v2186_v13, %v1339_v48 }
 0x8e9   :  { %1386 = vst [vmem:[#allocation5] sm:$0xff] %v1370_v18 }
 0x8ec   :  { %v1575_v59 = vpop.eup %1574 }
 0x8ed   :  { %v1341_v49 = vmul.f32 0.6931472, %v1575_v59  ;;  %v1311_v43 = vpop.xlane.xlu2 %1310 }
 0x8ee   :  { %1576 = vlog2.f32 %v1311_v43 }
 0x8ef   :  { %v1371_v33 = vsub.f32 %v2194_v2, %v1341_v49 }
 0x8f1   :  { %1387 = vst [vmem:[#allocation5 + $0x8] sm:$0xff] %v1371_v33 }
 0x8f4   :  { %v1577_v34 = vpop.eup %1576 }
 0x8f5   :  { %v1343_v53 = vmul.f32 0.6931472, %v1577_v34  ;;  %v1313_v37 = vpop.xlane.xlu2 %1312 }
 0x8f6   :  { %1578 = vlog2.f32 %v1313_v37 }
 0x8f7   :  { %v1372_v19 = vsub.f32 %v2200_v28, %v1343_v53 }
 0x8f9   :  { %1388 = vst [vmem:[#allocation5 + $0x10] sm:$0xff] %v1372_v19 }
 0x8fc   :  { %v1579_v9 = vpop.eup %1578 }
 0x8fd   :  { %v1345_v54 = vmul.f32 0.6931472, %v1579_v9  ;;  %v1315_v21 = vpop.xlane.xlu2 %1314 }
 0x8fe   :  { %1580 = vlog2.f32 %v1315_v21 }
 0x8ff   :  { %v1373_v13 = vsub.f32 %v2205_v6, %v1345_v54 }
 0x901   :  { %1389 = vst [vmem:[#allocation5 + $0x18] sm:$0xff] %v1373_v13 }
 0x904   :  { %v1581_v55 = vpop.eup %1580 }
 0x905   :  { %v1347_v16 = vmul.f32 0.6931472, %v1581_v55  ;;  %v1317_v22 = vpop.xlane.xlu2 %1316 }
 0x906   :  { %1582 = vlog2.f32 %v1317_v22 }
 0x907   :  { %v1374_v2 = vsub.f32 %v2210_v41, %v1347_v16 }
 0x909   :  { %1390 = vst [vmem:[#allocation5 + $0x20] sm:$0xff] %v1374_v2 }
 0x90c   :  { %v1583_v17 = vpop.eup %1582 }
 0x90d   :  { %v1349_v56 = vmul.f32 0.6931472, %v1583_v17  ;;  %v1319_v36 = vpop.xlane.xlu2 %1318 }
 0x90e   :  { %1584 = vlog2.f32 %v1319_v36 }
 0x90f   :  { %v1375_v28 = vsub.f32 %v2215_v47, %v1349_v56 }
 0x911   :  { %1391 = vst [vmem:[#allocation5 + $0x28] sm:$0xff] %v1375_v28 }
 0x914   :  { %v1585_v58 = vpop.eup %1584 }
 0x915   :  { %v1351_v62 = vmul.f32 0.6931472, %v1585_v58  ;;  %v1321_v63 = vpop.xlane.xlu2 %1320 }
 0x916   :  { %1586 = vlog2.f32 %v1321_v63 }
 0x917   :  { %v1376_v6 = vsub.f32 %v2221_v12, %v1351_v62 }
 0x919   :  { %1392 = vst [vmem:[#allocation5 + $0x30] sm:$0xff] %v1376_v6 }
 0x91c   :  { %v1587_v30 = vpop.eup %1586 }
 0x91d   :  { %v1353_v50 = vmul.f32 0.6931472, %v1587_v30  ;;  %v1323_v3 = vpop.xlane.xlu2 %1322 }
 0x91e   :  { %1588 = vlog2.f32 %v1323_v3 }
 0x91f   :  { %v1377_v41 = vsub.f32 %v2227_v8, %v1353_v50 }
 0x921   :  { %1393 = vst [vmem:[#allocation5 + $0x38] sm:$0xff] %v1377_v41 }
 0x924   :  { %v1589_v10 = vpop.eup %1588 }
 0x925   :  { %v1355_v14 = vmul.f32 0.6931472, %v1589_v10  ;;  %v1325_v44 = vpop.xlane.xlu2 %1324 }
 0x926   :  { %1590 = vlog2.f32 %v1325_v44 }
 0x927   :  { %v1378_v47 = vsub.f32 %v2233_v57, %v1355_v14 }
 0x929   :  { %1394 = vst [vmem:[#allocation5 + $0x40] sm:$0xff] %v1378_v47 }
 0x92c   :  { %v1591_v1 = vpop.eup %1590 }
 0x92d   :  { %v1357_v20 = vmul.f32 0.6931472, %v1591_v1  ;;  %v1327_v23 = vpop.xlane.xlu2 %1326 }
 0x92e   :  { %1592 = vlog2.f32 %v1327_v23 }
 0x92f   :  { %v1379_v12 = vsub.f32 %v2239_v42, %v1357_v20 }
 0x931   :  { %1395 = vst [vmem:[#allocation5 + $0x48] sm:$0xff] %v1379_v12 }
 0x934   :  { %v1593_v4 = vpop.eup %1592 }
 0x935   :  { %v1359_v27 = vmul.f32 0.6931472, %v1593_v4  ;;  %v1329_v24 = vpop.xlane.xlu2 %1328 }
 0x936   :  { %1594 = vlog2.f32 %v1329_v24 }
 0x937   :  { %v1380_v8 = vsub.f32 %v2245_v38, %v1359_v27 }
 0x939   :  { %1396 = vst [vmem:[#allocation5 + $0x50] sm:$0xff] %v1380_v8 }
 0x93c   :  { %v1595_v31 = vpop.eup %1594 }
 0x93d   :  { %v1361_v60 = vmul.f32 0.6931472, %v1595_v31  ;;  %v1331_v25 = vpop.xlane.xlu2 %1330 }
 0x93e   :  { %1596 = vlog2.f32 %v1331_v25 }
 0x93f   :  { %v1381_v57 = vsub.f32 %v2251_v0, %v1361_v60 }
 0x941   :  { %1397 = vst [vmem:[#allocation5 + $0x58] sm:$0xff] %v1381_v57 }
 0x944   :  { %v1597_v7 = vpop.eup %1596 }
 0x945   :  { %v1363_v40 = vmul.f32 0.6931472, %v1597_v7  ;;  %v1333_v61 = vpop.xlane.xlu2 %1332 }
 0x946   :  { %1598 = vlog2.f32 %v1333_v61 }
 0x947   :  { %v1382_v42 = vsub.f32 %v2257_v15, %v1363_v40 }
 0x949   :  { %1398 = vst [vmem:[#allocation5 + $0x60] sm:$0xff] %v1382_v42 }
 0x94c   :  { %v1599_v39 = vpop.eup %1598 }
 0x94d   :  { %v1365_v45 = vmul.f32 0.6931472, %v1599_v39  ;;  %v1335_v46 = vpop.xlane.xlu1 %1334 }
 0x94e   :  { %1600 = vlog2.f32 %v1335_v46 }
 0x94f   :  { %v1383_v38 = vsub.f32 %v2263_v26, %v1365_v45 }
 0x951   :  { %1399 = vst [vmem:[#allocation5 + $0x68] sm:$0xff] %v1383_v38 }
 0x954   :  { %v1601_v5 = vpop.eup %1600 }
 0x955   :  { %v1367_v51 = vmul.f32 0.6931472, %v1601_v5  ;;  %v1337_v29 = vpop.xlane.xlu2 %1336 }
 0x956   :  { %1602 = vlog2.f32 %v1337_v29 }
 0x957   :  { %v1384_v0 = vsub.f32 %v2269_v32, %v1367_v51 }
 0x959   :  { %1400 = vst [vmem:[#allocation5 + $0x70] sm:$0xff] %v1384_v0 }
 0x95c   :  { %v1603_v15 = vpop.eup %1602 }
 0x95d   :  { %v1369_v52 = vmul.f32 0.6931472, %v1603_v15 }
 0x95f   :  { %v1385_v26 = vsub.f32 %v2275_v35, %v1369_v52 }
 0x961   :  { %1401 = vst [vmem:[#allocation5 + $0x78] sm:$0xff] %v1385_v26 }
 0x962   :  { %1414 = dma.vmem_to_hbm [thread:$0]  %s1407_s11, 2048, %s1409_s14, [#allocation4], %s1660_s15, %s1660_s15, %s1661_s16  }
 0x963   :  { %1654 = dma.done.wait [#allocation4], 2048  }
 0x964   :  { %1655 = vsyncadd [#allocation4], 4294965248 }
 0x965   :  { %1419 = vsyncpa [#allocation3], 1 }
 0x966   :  { %1420 = vsyncpa [#allocation4], 1 }

</bundles_post_ra>
